<compile_context>
chip_gen: v7x
topology: tpu7x:2x2x1
jax: 0.10.0
libtpu: 0.0.40
codegen_flags: <defaults>
</compile_context>

<pallas_src>
import functools
import math

import jax
import jax.numpy as jnp
from jax.experimental import pallas as pl
from jax.experimental.pallas import tpu as pltpu  # noqa: F401  (kept for TPU-specific knobs)


_MASK_VALUE = -1e30
_LN_EPS = 1e-5


def _round_up(x: int, m: int) -> int:
    return (x + m - 1) // m * m


def _build_pe(d_model: int, max_len: int = 5000) -> jnp.ndarray:
    """Sinusoidal positional encodings as a lane-dense 2-D (max_len, d_model) table."""
    position = jnp.arange(max_len, dtype=jnp.float32)[:, None]
    div_term = jnp.exp(
        jnp.arange(0, d_model, 2, dtype=jnp.float32) * (-math.log(10000.0) / d_model))
    pe = jnp.zeros((max_len, d_model), dtype=jnp.float32)
    pe = pe.at[:, 0::2].set(jnp.sin(position * div_term))
    pe = pe.at[:, 1::2].set(jnp.cos(position * div_term))
    return pe


# ------------------------------------------------------------------ fused kernel ----
def _transam_kernel(
        x_ref, mask_ref, sel_ref, pe_ref,
        w1_ref, b1_ref, w2_ref, b2_ref, w3_ref, b3_ref,
        wq_ref, bq_ref, wk_ref, bk_ref, wv_ref, bv_ref, wo_ref, bo_ref,
        ln1g_ref, ln1b_ref,
        wf1_ref, bf1_ref, wf2_ref, bf2_ref,
        ln2g_ref, ln2b_ref,
        wout_ref, bout_ref,
        o_ref, *, scale: float):
    """Whole TransAm forward on one VMEM-resident working set (no grid)."""
    f32 = jnp.float32

    def linear(x, w_ref, b_ref, relu=False):
        y = jnp.dot(x, w_ref[...], preferred_element_type=f32) + b_ref[...]
        return jnp.maximum(y, 0.0) if relu else y

    def layernorm(x, g_ref, b_ref):
        mu = jnp.mean(x, axis=-1, keepdims=True)
        cen = x - mu
        var = jnp.mean(cen * cen, axis=-1, keepdims=True)
        return cen * jax.lax.rsqrt(var + _LN_EPS) * g_ref[...] + b_ref[...]

    x = x_ref[...].astype(f32)

    # MLP front end + positional encoding (fused, stays in vregs).
    h = linear(x, w1_ref, b1_ref, relu=True)
    h = linear(h, w2_ref, b2_ref, relu=True)
    h = linear(h, w3_ref, b3_ref, relu=True) + pe_ref[...]

    # Single-head self-attention over ALL rows at once; mask_ref is the additive
    # block-diagonal causal mask; the 1/sqrt(d_model) scale is folded into q.
    q = linear(h, wq_ref, bq_ref) * scale
    k = linear(h, wk_ref, bk_ref)
    v = linear(h, wv_ref, bv_ref)
    s = jax.lax.dot_general(q, k, (((1,), (1,)), ((), ())),
                            preferred_element_type=f32) + mask_ref[...]
    m = jnp.max(s, axis=-1, keepdims=True)
    p = jnp.exp(s - m)
    # approx=True is the standard choice once attention tiles grow; the exact reciprocal
    # is free at this size and keeps the f32 reference tolerance tight.
    p = p * pl.reciprocal(jnp.sum(p, axis=-1, keepdims=True), approx=False)
    ctx = jnp.dot(p, v, preferred_element_type=f32)
    sa = linear(ctx, wo_ref, bo_ref)

    x1 = layernorm(h + sa, ln1g_ref, ln1b_ref)                       # (R, d_model)

    # Only the last real time step feeds out1 -> FFN / LN2 / head on B rows only.
    last = jnp.dot(sel_ref[...], x1, preferred_element_type=f32)     # (B, d_model)
    ff = linear(linear(last, wf1_ref, bf1_ref, relu=True), wf2_ref, bf2_ref)
    x2 = layernorm(last + ff, ln2g_ref, ln2b_ref)

    o_ref[...] = linear(x2, wout_ref, bout_ref).astype(o_ref.dtype)


# ------------------------------------------------------------------ wrapper ---------
def transam_forward(params, src):
    """Pallas forward of TransAm. src: (S, B, N_STATES) f32 -> (B, outputs) f32."""
    S, B, F = src.shape
    R = S * B
    d_model = params["W3"].shape[1]
    d_ff = params["Wf1"].shape[1]
    outputs = params["Wout"].shape[1]
    Fp = params["W1"].shape[0]          # fc1 input dim, pre-padded to a multiple of 8
    assert S <= params["pe"].shape[0]

    # Seq-major 2-D layout: row r = s*B + b  =>  (S,B,F) -> (R,F) is a pure reshape.
    x = src.reshape(R, F)
    if Fp != F:
        x = jnp.pad(x, ((0, 0), (0, Fp - F)))

    # Per-row positional encoding (row r -> position r // B).
    pe_rows = jnp.repeat(params["pe"][:S], B, axis=0)                          # (R, d_model)

    # Additive attention mask: same batch element & causal (col position <= row position).
    r = jnp.arange(R)
    keep = ((r[:, None] % B) == (r[None, :] % B)) & \
           ((r[None, :] // B) <= (r[:, None] // B))
    mask = jnp.where(keep, 0.0, _MASK_VALUE).astype(jnp.float32)               # (R, R)

    # Selection matrix picking the last real time step of each batch element.
    sel = (r[None, :] == (S - 1) * B + jnp.arange(B)[:, None]).astype(jnp.float32)  # (B, R)

    args = (
        x, mask, sel, pe_rows,
        params["W1"], params["b1"], params["W2"], params["b2"], params["W3"], params["b3"],
        params["Wq"], params["bq"], params["Wk"], params["bk"], params["Wv"], params["bv"],
        params["Wo"], params["bo"], params["ln1_g"], params["ln1_b"],
        params["Wf1"], params["bf1"], params["Wf2"], params["bf2"],
        params["ln2_g"], params["ln2_b"], params["Wout"], params["bout"],
    )

    flops = (2 * R * (Fp * 16 + 16 * d_model + 5 * d_model * d_model)
             + 4 * R * R * d_model
             + 2 * B * (R * d_model + 2 * d_model * d_ff + d_model * outputs))
    bytes_accessed = sum(int(a.size) * a.dtype.itemsize for a in args) + B * outputs * 4
    cost = pl.CostEstimate(flops=int(flops),
                           transcendentals=int(R * R + 2 * R + 2 * B),
                           bytes_accessed=int(bytes_accessed))

    kernel = functools.partial(_transam_kernel, scale=1.0 / math.sqrt(d_model))
    # No grid / BlockSpecs: every operand is loaded whole into VMEM (total working set
    # ~0.55 MiB — far inside the scoped-VMEM budget on v5e/v6e and v7x's 64 MiB part).
    return pl.pallas_call(
        kernel,
        out_shape=jax.ShapeDtypeStruct((B, outputs), src.dtype),
        cost_estimate=cost,
    )(*args)


# ------------------------------------------------------------------ reference -------
def transam_reference(params, src):
    """Pure-JAX reference with the same math (high-precision matmuls)."""
    hp = jax.lax.Precision.HIGHEST
    mm = functools.partial(jnp.dot, precision=hp)
    S, _, F = src.shape
    pe = params["pe"]

    x = jax.nn.relu(mm(src, params["W1"][:F]) + params["b1"])
    x = jax.nn.relu(mm(x, params["W2"]) + params["b2"])
    x = jax.nn.relu(mm(x, params["W3"]) + params["b3"])
    x = x + pe[:S][:, None, :]

    d_model = x.shape[-1]
    q = mm(x, params["Wq"]) + params["bq"]
    k = mm(x, params["Wk"]) + params["bk"]
    v = mm(x, params["Wv"]) + params["bv"]
    s = jnp.einsum("sbd,tbd->bst", q, k, precision=hp) / math.sqrt(d_model)
    idx = jnp.arange(S)
    keep = idx[None, :] <= idx[:, None]                       # causal (j <= i)
    s = jnp.where(keep[None], s, _MASK_VALUE)
    p = jax.nn.softmax(s, axis=-1)
    ctx = jnp.einsum("bst,tbd->sbd", p, v, precision=hp)
    sa = mm(ctx, params["Wo"]) + params["bo"]

    def ln(z, g, b):
        mu = jnp.mean(z, -1, keepdims=True)
        var = jnp.mean((z - mu) ** 2, -1, keepdims=True)
        return (z - mu) * jax.lax.rsqrt(var + _LN_EPS) * g + b

    x1 = ln(x + sa, params["ln1_g"], params["ln1_b"])
    ff = mm(jax.nn.relu(mm(x1, params["Wf1"]) + params["bf1"]), params["Wf2"]) + params["bf2"]
    x2 = ln(x1 + ff, params["ln2_g"], params["ln2_b"])
    return mm(x2[-1], params["Wout"]) + params["bout"]


def init_params(key, n_states, outputs, d_model=32, d_ff=2048, max_len=5000):
    """Parameters stored kernel-ready: W1 pre-padded to a multiple-of-8 input dim and all
    biases / LayerNorm affines pre-reshaped to (1, N) — done once, not per call."""
    ks = iter(jax.random.split(key, 24))

    def w(fan_in, fan_out, std=0.1):
        return jax.random.normal(next(ks), (fan_in, fan_out), jnp.float32) * std

    def b(n, std=0.05):
        return jax.random.normal(next(ks), (1, n), jnp.float32) * std

    n_states_p = max(8, _round_up(n_states, 8))
    w1 = jnp.zeros((n_states_p, 16), jnp.float32).at[:n_states].set(w(n_states, 16))

    return {
        "pe": _build_pe(d_model, max_len),
        "W1": w1, "b1": b(16),
        "W2": w(16, d_model), "b2": b(d_model),
        "W3": w(d_model, d_model), "b3": b(d_model),
        "Wq": w(d_model, d_model), "bq": b(d_model),
        "Wk": w(d_model, d_model), "bk": b(d_model),
        "Wv": w(d_model, d_model), "bv": b(d_model),
        "Wo": w(d_model, d_model), "bo": b(d_model),
        "ln1_g": jnp.ones((1, d_model), jnp.float32),
        "ln1_b": jnp.zeros((1, d_model), jnp.float32),
        "Wf1": w(d_model, d_ff), "bf1": b(d_ff),
        "Wf2": w(d_ff, d_model), "bf2": b(d_model),
        "ln2_g": jnp.ones((1, d_model), jnp.float32),
        "ln2_b": jnp.zeros((1, d_model), jnp.float32),
        "Wout": w(d_model, outputs), "bout": b(outputs),
    }


if __name__ == "__main__":
    SEQ = 10         # == max_length in the original script (its causal mask is 10x10)
    BATCH = 2
    N_STATES = 4
    D_MODEL = 32
    OUTPUTS = 2

    root = jax.random.PRNGKey(0)
    k_params, k_src = jax.random.split(root)
    params = init_params(k_params, N_STATES, OUTPUTS, d_model=D_MODEL)
    src = jax.random.normal(k_src, (SEQ, BATCH, N_STATES), dtype=jnp.float32)

    fwd = jax.jit(transam_forward)
    out = jax.block_until_ready(fwd(params, src))

    ref = transam_reference(params, src)
    assert out.shape == (BATCH, OUTPUTS), out.shape
    max_err = float(jnp.max(jnp.abs(out - ref)))
    assert jnp.allclose(out, ref, atol=5e-3, rtol=5e-3), f"mismatch vs reference, max|err|={max_err}"
    print("KERNEL_OK")
</pallas_src>

<mosaic_0001>
module attributes {stable_mosaic.version = 11 : i64} {
  func.func @_transam_kernel(%arg0: memref<20x8xf32, #tpu.memory_space<vmem>>, %arg1: memref<20x20xf32, #tpu.memory_space<vmem>>, %arg2: memref<2x20xf32, #tpu.memory_space<vmem>>, %arg3: memref<20x32xf32, #tpu.memory_space<vmem>>, %arg4: memref<8x16xf32, #tpu.memory_space<vmem>>, %arg5: memref<1x16xf32, #tpu.memory_space<vmem>>, %arg6: memref<16x32xf32, #tpu.memory_space<vmem>>, %arg7: memref<1x32xf32, #tpu.memory_space<vmem>>, %arg8: memref<32x32xf32, #tpu.memory_space<vmem>>, %arg9: memref<1x32xf32, #tpu.memory_space<vmem>>, %arg10: memref<32x32xf32, #tpu.memory_space<vmem>>, %arg11: memref<1x32xf32, #tpu.memory_space<vmem>>, %arg12: memref<32x32xf32, #tpu.memory_space<vmem>>, %arg13: memref<1x32xf32, #tpu.memory_space<vmem>>, %arg14: memref<32x32xf32, #tpu.memory_space<vmem>>, %arg15: memref<1x32xf32, #tpu.memory_space<vmem>>, %arg16: memref<32x32xf32, #tpu.memory_space<vmem>>, %arg17: memref<1x32xf32, #tpu.memory_space<vmem>>, %arg18: memref<1x32xf32, #tpu.memory_space<vmem>>, %arg19: memref<1x32xf32, #tpu.memory_space<vmem>>, %arg20: memref<32x2048xf32, #tpu.memory_space<vmem>>, %arg21: memref<1x2048xf32, #tpu.memory_space<vmem>>, %arg22: memref<2048x32xf32, #tpu.memory_space<vmem>>, %arg23: memref<1x32xf32, #tpu.memory_space<vmem>>, %arg24: memref<1x32xf32, #tpu.memory_space<vmem>>, %arg25: memref<1x32xf32, #tpu.memory_space<vmem>>, %arg26: memref<32x2xf32, #tpu.memory_space<vmem>>, %arg27: memref<1x2xf32, #tpu.memory_space<vmem>>, %arg28: memref<2x2xf32, #tpu.memory_space<vmem>>) attributes {dimension_semantics = [], scalar_prefetch = 0 : i64, scratch_operands = 0 : i64, tpu.core_type = #tpu.core_type<tc>} {
    %c0 = arith.constant 0 : index
    %c0_0 = arith.constant 0 : index
    %0 = vector.load %arg0[%c0, %c0_0] : memref<20x8xf32, #tpu.memory_space<vmem>>, vector<20x8xf32>
    %c0_1 = arith.constant 0 : index
    %c0_2 = arith.constant 0 : index
    %1 = vector.load %arg4[%c0_1, %c0_2] : memref<8x16xf32, #tpu.memory_space<vmem>>, vector<8x16xf32>
    %cst = arith.constant dense<0.000000e+00> : vector<20x16xf32>
    %2 = tpu.matmul %0, %1, %cst {dimension_numbers = #tpu.dot_dimension_numbers<[1], [0], [0], [1], [0, 0, 1, 1], [], []>} : vector<20x8xf32>, vector<8x16xf32>, vector<20x16xf32> -> vector<20x16xf32>
    %c0_3 = arith.constant 0 : index
    %c0_4 = arith.constant 0 : index
    %3 = vector.load %arg5[%c0_3, %c0_4] : memref<1x16xf32, #tpu.memory_space<vmem>>, vector<1x16xf32>
    %4 = vector.broadcast %3 : vector<1x16xf32> to vector<20x16xf32>
    %5 = arith.addf %2, %4 : vector<20x16xf32>
    %cst_5 = arith.constant 0.000000e+00 : f32
    %6 = vector.broadcast %cst_5 : f32 to vector<20x16xf32>
    %7 = arith.maximumf %5, %6 : vector<20x16xf32>
    %c0_6 = arith.constant 0 : index
    %c0_7 = arith.constant 0 : index
    %8 = vector.load %arg6[%c0_6, %c0_7] : memref<16x32xf32, #tpu.memory_space<vmem>>, vector<16x32xf32>
    %cst_8 = arith.constant dense<0.000000e+00> : vector<20x32xf32>
    %9 = tpu.matmul %7, %8, %cst_8 {dimension_numbers = #tpu.dot_dimension_numbers<[1], [0], [0], [1], [0, 0, 1, 1], [], []>} : vector<20x16xf32>, vector<16x32xf32>, vector<20x32xf32> -> vector<20x32xf32>
    %c0_9 = arith.constant 0 : index
    %c0_10 = arith.constant 0 : index
    %10 = vector.load %arg7[%c0_9, %c0_10] : memref<1x32xf32, #tpu.memory_space<vmem>>, vector<1x32xf32>
    %11 = vector.broadcast %10 : vector<1x32xf32> to vector<20x32xf32>
    %12 = arith.addf %9, %11 : vector<20x32xf32>
    %cst_11 = arith.constant 0.000000e+00 : f32
    %13 = vector.broadcast %cst_11 : f32 to vector<20x32xf32>
    %14 = arith.maximumf %12, %13 : vector<20x32xf32>
    %c0_12 = arith.constant 0 : index
    %c0_13 = arith.constant 0 : index
    %15 = vector.load %arg8[%c0_12, %c0_13] : memref<32x32xf32, #tpu.memory_space<vmem>>, vector<32x32xf32>
    %cst_14 = arith.constant dense<0.000000e+00> : vector<20x32xf32>
    %16 = tpu.matmul %14, %15, %cst_14 {dimension_numbers = #tpu.dot_dimension_numbers<[1], [0], [0], [1], [0, 0, 1, 1], [], []>} : vector<20x32xf32>, vector<32x32xf32>, vector<20x32xf32> -> vector<20x32xf32>
    %c0_15 = arith.constant 0 : index
    %c0_16 = arith.constant 0 : index
    %17 = vector.load %arg9[%c0_15, %c0_16] : memref<1x32xf32, #tpu.memory_space<vmem>>, vector<1x32xf32>
    %18 = vector.broadcast %17 : vector<1x32xf32> to vector<20x32xf32>
    %19 = arith.addf %16, %18 : vector<20x32xf32>
    %cst_17 = arith.constant 0.000000e+00 : f32
    %20 = vector.broadcast %cst_17 : f32 to vector<20x32xf32>
    %21 = arith.maximumf %19, %20 : vector<20x32xf32>
    %c0_18 = arith.constant 0 : index
    %c0_19 = arith.constant 0 : index
    %22 = vector.load %arg3[%c0_18, %c0_19] : memref<20x32xf32, #tpu.memory_space<vmem>>, vector<20x32xf32>
    %23 = arith.addf %21, %22 : vector<20x32xf32>
    %c0_20 = arith.constant 0 : index
    %c0_21 = arith.constant 0 : index
    %24 = vector.load %arg10[%c0_20, %c0_21] : memref<32x32xf32, #tpu.memory_space<vmem>>, vector<32x32xf32>
    %cst_22 = arith.constant dense<0.000000e+00> : vector<20x32xf32>
    %25 = tpu.matmul %23, %24, %cst_22 {dimension_numbers = #tpu.dot_dimension_numbers<[1], [0], [0], [1], [0, 0, 1, 1], [], []>} : vector<20x32xf32>, vector<32x32xf32>, vector<20x32xf32> -> vector<20x32xf32>
    %c0_23 = arith.constant 0 : index
    %c0_24 = arith.constant 0 : index
    %26 = vector.load %arg11[%c0_23, %c0_24] : memref<1x32xf32, #tpu.memory_space<vmem>>, vector<1x32xf32>
    %27 = vector.broadcast %26 : vector<1x32xf32> to vector<20x32xf32>
    %28 = arith.addf %25, %27 : vector<20x32xf32>
    %cst_25 = arith.constant 0.176776692 : f32
    %29 = vector.broadcast %cst_25 : f32 to vector<20x32xf32>
    %30 = arith.mulf %28, %29 : vector<20x32xf32>
    %c0_26 = arith.constant 0 : index
    %c0_27 = arith.constant 0 : index
    %31 = vector.load %arg12[%c0_26, %c0_27] : memref<32x32xf32, #tpu.memory_space<vmem>>, vector<32x32xf32>
    %cst_28 = arith.constant dense<0.000000e+00> : vector<20x32xf32>
    %32 = tpu.matmul %23, %31, %cst_28 {dimension_numbers = #tpu.dot_dimension_numbers<[1], [0], [0], [1], [0, 0, 1, 1], [], []>} : vector<20x32xf32>, vector<32x32xf32>, vector<20x32xf32> -> vector<20x32xf32>
    %c0_29 = arith.constant 0 : index
    %c0_30 = arith.constant 0 : index
    %33 = vector.load %arg13[%c0_29, %c0_30] : memref<1x32xf32, #tpu.memory_space<vmem>>, vector<1x32xf32>
    %34 = vector.broadcast %33 : vector<1x32xf32> to vector<20x32xf32>
    %35 = arith.addf %32, %34 : vector<20x32xf32>
    %c0_31 = arith.constant 0 : index
    %c0_32 = arith.constant 0 : index
    %36 = vector.load %arg14[%c0_31, %c0_32] : memref<32x32xf32, #tpu.memory_space<vmem>>, vector<32x32xf32>
    %cst_33 = arith.constant dense<0.000000e+00> : vector<20x32xf32>
    %37 = tpu.matmul %23, %36, %cst_33 {dimension_numbers = #tpu.dot_dimension_numbers<[1], [0], [0], [1], [0, 0, 1, 1], [], []>} : vector<20x32xf32>, vector<32x32xf32>, vector<20x32xf32> -> vector<20x32xf32>
    %c0_34 = arith.constant 0 : index
    %c0_35 = arith.constant 0 : index
    %38 = vector.load %arg15[%c0_34, %c0_35] : memref<1x32xf32, #tpu.memory_space<vmem>>, vector<1x32xf32>
    %39 = vector.broadcast %38 : vector<1x32xf32> to vector<20x32xf32>
    %40 = arith.addf %37, %39 : vector<20x32xf32>
    %cst_36 = arith.constant dense<0.000000e+00> : vector<20x20xf32>
    %41 = tpu.matmul %30, %35, %cst_36 {dimension_numbers = #tpu.dot_dimension_numbers<[1], [1], [0], [0], [0, 0, 1, 0], [], []>} : vector<20x32xf32>, vector<20x32xf32>, vector<20x20xf32> -> vector<20x20xf32>
    %c0_37 = arith.constant 0 : index
    %c0_38 = arith.constant 0 : index
    %42 = vector.load %arg1[%c0_37, %c0_38] : memref<20x20xf32, #tpu.memory_space<vmem>>, vector<20x20xf32>
    %43 = arith.addf %41, %42 : vector<20x20xf32>
    %cst_39 = arith.constant dense<0xFF800000> : vector<20xf32>
    %44 = vector.multi_reduction <maximumf>, %43, %cst_39 [1] : vector<20x20xf32> to vector<20xf32>
    %45 = vector.shape_cast %44 : vector<20xf32> to vector<20x1xf32>
    %46 = vector.broadcast %45 : vector<20x1xf32> to vector<20x20xf32>
    %47 = arith.subf %43, %46 : vector<20x20xf32>
    %48 = math.exp %47 : vector<20x20xf32>
    %cst_40 = arith.constant dense<0.000000e+00> : vector<20xf32>
    %49 = vector.multi_reduction <add>, %48, %cst_40 [1] : vector<20x20xf32> to vector<20xf32>
    %50 = vector.shape_cast %49 : vector<20xf32> to vector<20x1xf32>
    %51 = tpu.reciprocal %50 : vector<20x1xf32> -> vector<20x1xf32>
    %52 = vector.broadcast %51 : vector<20x1xf32> to vector<20x20xf32>
    %53 = arith.mulf %48, %52 : vector<20x20xf32>
    %cst_41 = arith.constant dense<0.000000e+00> : vector<20x32xf32>
    %54 = tpu.matmul %53, %40, %cst_41 {dimension_numbers = #tpu.dot_dimension_numbers<[1], [0], [0], [1], [0, 0, 1, 1], [], []>} : vector<20x20xf32>, vector<20x32xf32>, vector<20x32xf32> -> vector<20x32xf32>
    %c0_42 = arith.constant 0 : index
    %c0_43 = arith.constant 0 : index
    %55 = vector.load %arg16[%c0_42, %c0_43] : memref<32x32xf32, #tpu.memory_space<vmem>>, vector<32x32xf32>
    %cst_44 = arith.constant dense<0.000000e+00> : vector<20x32xf32>
    %56 = tpu.matmul %54, %55, %cst_44 {dimension_numbers = #tpu.dot_dimension_numbers<[1], [0], [0], [1], [0, 0, 1, 1], [], []>} : vector<20x32xf32>, vector<32x32xf32>, vector<20x32xf32> -> vector<20x32xf32>
    %c0_45 = arith.constant 0 : index
    %c0_46 = arith.constant 0 : index
    %57 = vector.load %arg17[%c0_45, %c0_46] : memref<1x32xf32, #tpu.memory_space<vmem>>, vector<1x32xf32>
    %58 = vector.broadcast %57 : vector<1x32xf32> to vector<20x32xf32>
    %59 = arith.addf %56, %58 : vector<20x32xf32>
    %60 = arith.addf %23, %59 : vector<20x32xf32>
    %cst_47 = arith.constant dense<0.000000e+00> : vector<20xf32>
    %61 = vector.multi_reduction <add>, %60, %cst_47 [1] : vector<20x32xf32> to vector<20xf32>
    %62 = vector.shape_cast %61 : vector<20xf32> to vector<20x1xf32>
    %cst_48 = arith.constant 3.200000e+01 : f32
    %63 = vector.broadcast %cst_48 : f32 to vector<20x1xf32>
    %64 = arith.divf %62, %63 : vector<20x1xf32>
    %65 = vector.broadcast %64 : vector<20x1xf32> to vector<20x32xf32>
    %66 = arith.subf %60, %65 : vector<20x32xf32>
    %67 = arith.mulf %66, %66 : vector<20x32xf32>
    %cst_49 = arith.constant dense<0.000000e+00> : vector<20xf32>
    %68 = vector.multi_reduction <add>, %67, %cst_49 [1] : vector<20x32xf32> to vector<20xf32>
    %69 = vector.shape_cast %68 : vector<20xf32> to vector<20x1xf32>
    %cst_50 = arith.constant 3.200000e+01 : f32
    %70 = vector.broadcast %cst_50 : f32 to vector<20x1xf32>
    %71 = arith.divf %69, %70 : vector<20x1xf32>
    %cst_51 = arith.constant 9.99999974E-6 : f32
    %72 = vector.broadcast %cst_51 : f32 to vector<20x1xf32>
    %73 = arith.addf %71, %72 : vector<20x1xf32>
    %74 = math.rsqrt %73 : vector<20x1xf32>
    %75 = vector.broadcast %74 : vector<20x1xf32> to vector<20x32xf32>
    %76 = arith.mulf %66, %75 : vector<20x32xf32>
    %c0_52 = arith.constant 0 : index
    %c0_53 = arith.constant 0 : index
    %77 = vector.load %arg18[%c0_52, %c0_53] : memref<1x32xf32, #tpu.memory_space<vmem>>, vector<1x32xf32>
    %78 = vector.broadcast %77 : vector<1x32xf32> to vector<20x32xf32>
    %79 = arith.mulf %76, %78 : vector<20x32xf32>
    %c0_54 = arith.constant 0 : index
    %c0_55 = arith.constant 0 : index
    %80 = vector.load %arg19[%c0_54, %c0_55] : memref<1x32xf32, #tpu.memory_space<vmem>>, vector<1x32xf32>
    %81 = vector.broadcast %80 : vector<1x32xf32> to vector<20x32xf32>
    %82 = arith.addf %79, %81 : vector<20x32xf32>
    %c0_56 = arith.constant 0 : index
    %c0_57 = arith.constant 0 : index
    %83 = vector.load %arg2[%c0_56, %c0_57] : memref<2x20xf32, #tpu.memory_space<vmem>>, vector<2x20xf32>
    %cst_58 = arith.constant dense<0.000000e+00> : vector<2x32xf32>
    %84 = tpu.matmul %83, %82, %cst_58 {dimension_numbers = #tpu.dot_dimension_numbers<[1], [0], [0], [1], [0, 0, 1, 1], [], []>} : vector<2x20xf32>, vector<20x32xf32>, vector<2x32xf32> -> vector<2x32xf32>
    %c0_59 = arith.constant 0 : index
    %c0_60 = arith.constant 0 : index
    %85 = vector.load %arg20[%c0_59, %c0_60] : memref<32x2048xf32, #tpu.memory_space<vmem>>, vector<32x2048xf32>
    %cst_61 = arith.constant dense<0.000000e+00> : vector<2x2048xf32>
    %86 = tpu.matmul %84, %85, %cst_61 {dimension_numbers = #tpu.dot_dimension_numbers<[1], [0], [0], [1], [0, 0, 1, 1], [], []>} : vector<2x32xf32>, vector<32x2048xf32>, vector<2x2048xf32> -> vector<2x2048xf32>
    %c0_62 = arith.constant 0 : index
    %c0_63 = arith.constant 0 : index
    %87 = vector.load %arg21[%c0_62, %c0_63] : memref<1x2048xf32, #tpu.memory_space<vmem>>, vector<1x2048xf32>
    %88 = vector.broadcast %87 : vector<1x2048xf32> to vector<2x2048xf32>
    %89 = arith.addf %86, %88 : vector<2x2048xf32>
    %cst_64 = arith.constant 0.000000e+00 : f32
    %90 = vector.broadcast %cst_64 : f32 to vector<2x2048xf32>
    %91 = arith.maximumf %89, %90 : vector<2x2048xf32>
    %c0_65 = arith.constant 0 : index
    %c0_66 = arith.constant 0 : index
    %92 = vector.load %arg22[%c0_65, %c0_66] : memref<2048x32xf32, #tpu.memory_space<vmem>>, vector<2048x32xf32>
    %cst_67 = arith.constant dense<0.000000e+00> : vector<2x32xf32>
    %93 = tpu.matmul %91, %92, %cst_67 {dimension_numbers = #tpu.dot_dimension_numbers<[1], [0], [0], [1], [0, 0, 1, 1], [], []>} : vector<2x2048xf32>, vector<2048x32xf32>, vector<2x32xf32> -> vector<2x32xf32>
    %c0_68 = arith.constant 0 : index
    %c0_69 = arith.constant 0 : index
    %94 = vector.load %arg23[%c0_68, %c0_69] : memref<1x32xf32, #tpu.memory_space<vmem>>, vector<1x32xf32>
    %95 = vector.broadcast %94 : vector<1x32xf32> to vector<2x32xf32>
    %96 = arith.addf %93, %95 : vector<2x32xf32>
    %97 = arith.addf %84, %96 : vector<2x32xf32>
    %cst_70 = arith.constant dense<0.000000e+00> : vector<2xf32>
    %98 = vector.multi_reduction <add>, %97, %cst_70 [1] : vector<2x32xf32> to vector<2xf32>
    %99 = vector.shape_cast %98 : vector<2xf32> to vector<2x1xf32>
    %cst_71 = arith.constant 3.200000e+01 : f32
    %100 = vector.broadcast %cst_71 : f32 to vector<2x1xf32>
    %101 = arith.divf %99, %100 : vector<2x1xf32>
    %102 = vector.broadcast %101 : vector<2x1xf32> to vector<2x32xf32>
    %103 = arith.subf %97, %102 : vector<2x32xf32>
    %104 = arith.mulf %103, %103 : vector<2x32xf32>
    %cst_72 = arith.constant dense<0.000000e+00> : vector<2xf32>
    %105 = vector.multi_reduction <add>, %104, %cst_72 [1] : vector<2x32xf32> to vector<2xf32>
    %106 = vector.shape_cast %105 : vector<2xf32> to vector<2x1xf32>
    %cst_73 = arith.constant 3.200000e+01 : f32
    %107 = vector.broadcast %cst_73 : f32 to vector<2x1xf32>
    %108 = arith.divf %106, %107 : vector<2x1xf32>
    %cst_74 = arith.constant 9.99999974E-6 : f32
    %109 = vector.broadcast %cst_74 : f32 to vector<2x1xf32>
    %110 = arith.addf %108, %109 : vector<2x1xf32>
    %111 = math.rsqrt %110 : vector<2x1xf32>
    %112 = vector.broadcast %111 : vector<2x1xf32> to vector<2x32xf32>
    %113 = arith.mulf %103, %112 : vector<2x32xf32>
    %c0_75 = arith.constant 0 : index
    %c0_76 = arith.constant 0 : index
    %114 = vector.load %arg24[%c0_75, %c0_76] : memref<1x32xf32, #tpu.memory_space<vmem>>, vector<1x32xf32>
    %115 = vector.broadcast %114 : vector<1x32xf32> to vector<2x32xf32>
    %116 = arith.mulf %113, %115 : vector<2x32xf32>
    %c0_77 = arith.constant 0 : index
    %c0_78 = arith.constant 0 : index
    %117 = vector.load %arg25[%c0_77, %c0_78] : memref<1x32xf32, #tpu.memory_space<vmem>>, vector<1x32xf32>
    %118 = vector.broadcast %117 : vector<1x32xf32> to vector<2x32xf32>
    %119 = arith.addf %116, %118 : vector<2x32xf32>
    %c0_79 = arith.constant 0 : index
    %c0_80 = arith.constant 0 : index
    %120 = vector.load %arg26[%c0_79, %c0_80] : memref<32x2xf32, #tpu.memory_space<vmem>>, vector<32x2xf32>
    %cst_81 = arith.constant dense<0.000000e+00> : vector<2x2xf32>
    %121 = tpu.matmul %119, %120, %cst_81 {dimension_numbers = #tpu.dot_dimension_numbers<[1], [0], [0], [1], [0, 0, 1, 1], [], []>} : vector<2x32xf32>, vector<32x2xf32>, vector<2x2xf32> -> vector<2x2xf32>
    %c0_82 = arith.constant 0 : index
    %c0_83 = arith.constant 0 : index
    %122 = vector.load %arg27[%c0_82, %c0_83] : memref<1x2xf32, #tpu.memory_space<vmem>>, vector<1x2xf32>
    %123 = vector.broadcast %122 : vector<1x2xf32> to vector<2x2xf32>
    %124 = arith.addf %121, %123 : vector<2x2xf32>
    %c0_84 = arith.constant 0 : index
    %c0_85 = arith.constant 0 : index
    %125 = vector.load %arg28[%c0_84, %c0_85] : memref<2x2xf32, #tpu.memory_space<vmem>>, vector<2x2xf32>
    tpu.vector_store %arg28[%c0_84, %c0_85], %124 {strides = array<i32>} : memref<2x2xf32, #tpu.memory_space<vmem>>, vector<2x2xf32>,
    return
  }
}

</mosaic_0001>

<bundles_post_ra>
// kernel: transam_forward.1
= control target key start
LH: loop header
LB: loop body
LE: loop exit
PB: predicated region body
PF: predicated region fallthrough
CT: control target
= control target key end

     0   :  { %s5357_s0 = inlined_call_operand.vmem [shape: f32[20,8], index: 0, kind: input, shape index: {}]   ;;  %s5358_s1 = inlined_call_operand.vmem [shape: f32[20,20], index: 1, kind: input, shape index: {}]   ;;  %s5359_s2 = inlined_call_operand.vmem [shape: f32[2,20], index: 2, kind: input, shape index: {}]   ;;  %s5360_s3 = inlined_call_operand.vmem [shape: f32[20,32], index: 3, kind: input, shape index: {}]   ;;  %s5361_s4 = inlined_call_operand.vmem [shape: f32[8,16], index: 4, kind: input, shape index: {}]   ;;  %s5362_s5 = inlined_call_operand.vmem [shape: f32[1,16], index: 5, kind: input, shape index: {}]   ;;  %s5363_s6 = inlined_call_operand.vmem [shape: f32[16,32], index: 6, kind: input, shape index: {}]   ;;  %s5364_s7 = inlined_call_operand.vmem [shape: f32[1,32], index: 7, kind: input, shape index: {}]   ;;  %s5365_s8 = inlined_call_operand.vmem [shape: f32[32,32], index: 8, kind: input, shape index: {}]   ;;  %s5366_s9 = inlined_call_operand.vmem [shape: f32[1,32], index: 9, kind: input, shape index: {}]   ;;  %s5367_s10 = inlined_call_operand.vmem [shape: f32[32,32], index: 10, kind: input, shape index: {}]   ;;  %s5368_s11 = inlined_call_operand.vmem [shape: f32[1,32], index: 11, kind: input, shape index: {}]   ;;  %s5369_s12 = inlined_call_operand.vmem [shape: f32[32,32], index: 12, kind: input, shape index: {}]   ;;  %s5370_s13 = inlined_call_operand.vmem [shape: f32[1,32], index: 13, kind: input, shape index: {}]   ;;  %s5371_s14 = inlined_call_operand.vmem [shape: f32[32,32], index: 14, kind: input, shape index: {}]   ;;  %s5372_s15 = inlined_call_operand.vmem [shape: f32[1,32], index: 15, kind: input, shape index: {}]   ;;  %s5373_s16 = inlined_call_operand.vmem [shape: f32[32,32], index: 16, kind: input, shape index: {}]   ;;  %s5374_s17 = inlined_call_operand.vmem [shape: f32[1,32], index: 17, kind: input, shape index: {}]   ;;  %s5375_s18 = inlined_call_operand.vmem [shape: f32[1,32], index: 18, kind: input, shape index: {}]   ;;  %s5376_s19 = inlined_call_operand.vmem [shape: f32[1,32], index: 19, kind: input, shape index: {}]   ;;  %s5377_s20 = inlined_call_operand.vmem [shape: f32[32,2048], index: 20, kind: input, shape index: {}]   ;;  %s5378_s21 = inlined_call_operand.vmem [shape: f32[1,2048], index: 21, kind: input, shape index: {}]   ;;  %s5379_s22 = inlined_call_operand.vmem [shape: f32[2048,32], index: 22, kind: input, shape index: {}]   ;;  %s5380_s23 = inlined_call_operand.vmem [shape: f32[1,32], index: 23, kind: input, shape index: {}]   ;;  %s5381_s24 = inlined_call_operand.vmem [shape: f32[1,32], index: 24, kind: input, shape index: {}]   ;;  %s5382_s25 = inlined_call_operand.vmem [shape: f32[1,32], index: 25, kind: input, shape index: {}]   ;;  %s5383_s26 = inlined_call_operand.vmem [shape: f32[32,2], index: 26, kind: input, shape index: {}]   ;;  %s5384_s27 = inlined_call_operand.vmem [shape: f32[1,2], index: 27, kind: input, shape index: {}]   ;;  %s5385_s28 = inlined_call_operand.hbm [shape: f32[2,2], index: 28, kind: output, shape index: {}]  }
   0x1   :  { %5393 = sst [smem:[#allocation5_spill]] %s5357_s0 }
   0x2   :  { %5394 = sst [smem:[#allocation6_spill]] %s5358_s1 }
   0x3   :  { %5395 = sst [smem:[#allocation7_spill]] %s5359_s2 }
   0x4   :  { %5396 = sst [smem:[#allocation8_spill]] %s5360_s3 }
   0x5   :  { %5397 = sst [smem:[#allocation9_spill]] %s5361_s4 }
   0x6   :  { %5398 = sst [smem:[#allocation10_spill]] %s5362_s5 }
   0x7   :  { %5399 = sst [smem:[#allocation11_spill]] %s5363_s6 }
   0x8   :  { %5400 = sst [smem:[#allocation12_spill]] %s5364_s7 }
   0x9   :  { %5401 = sst [smem:[#allocation13_spill]] %s5365_s8 }
   0xa   :  { %5402 = sst [smem:[#allocation14_spill]] %s5366_s9 }
   0xb   :  { %5403 = sst [smem:[#allocation15_spill]] %s5367_s10 }
   0xc   :  { %5404 = sst [smem:[#allocation16_spill]] %s5368_s11 }
   0xd   :  { %5405 = sst [smem:[#allocation17_spill]] %s5369_s12 }
   0xe   :  { %5406 = sst [smem:[#allocation18_spill]] %s5380_s23 }
   0xf   :  { %s5407_s9 = sld [smem:[#allocation9_spill]]  ;;  %s5408_s23 = sld [smem:[#allocation5_spill]]  ;;  %vm101_vm0 = vcmask 64512   ;;  %v3826_v2 = vmov 0.0   ;;  %vm3827_vm1 = vmmov 0  }
  0x10   :  { %3250 = vmatprep.subr.mxu0 %v3826_v2  ;;  %3252 = vmatprep.mubr.msk.f32.mxu0 %vm3827_vm1, %v3826_v2 }
  0x15   :  { %v93_v0 = vld [vmem:[%s5407_s9] sm:$0xff] }
  0x16   :  { %v90_v1 = vld [vmem:[%s5408_s23] sm:$0xff] }
  0x17   :  { %33 = vsyncpa [#allocation3], 0  ;;  %3251 = vmatpush3.msra.mxu0 %v93_v0  ;;  %3265 = vmatprep.mubr.msk.f32.mxu1 %vm3827_vm1, %v3826_v2  ;;  %v91_v3 = vld [vmem:[%s5408_s23 + $0x8] sm:$0xff]  ;;  %v92_v4 = vld [vmem:[%s5408_s23 + $0x10] sm:$0xf]  ;;  %s5409_s7 = sld [smem:[#allocation11_spill]] }
  0x18   :  { %3253 = vmatmul.mubr.msk.f32.vlgmr.msra.gmra.mrb[0].mxu0 %vm101_vm0, %v90_v1  ;;  %v3828_v8 = vmov 0.0|0.0   ;;  %s5410_s8 = sld [smem:[#allocation13_spill]]  ;;  %s5411_s6 = sld [smem:[#allocation10_spill]]  ;;  %vm203_vm2 = vcmask 130048   ;;  %vm307_vm3 = vcmask 261120   ;;  %v600_v58 = vld [vmem:[%s5371_s14] sm:$0xff] }
  0x19   :  { %3255 = vmatprep.mubr.msk.f32.mxu0 %vm3827_vm1, %v3826_v2  ;;  %3409 = vmatprep.subr.bf16.mxu1 %v3828_v8  ;;  %s5412_s12 = sld [smem:[#allocation12_spill]]  ;;  %s5413_s4 = sld [smem:[#allocation15_spill]]  ;;  %v601_v59 = vld [vmem:[%s5371_s14 + $0x8] sm:$0xff]  ;;  %vm3438_vm4 = vmpackc.low %vm307_vm3, %vm307_vm3  ;;  %vm836_vm5 = vcmask 1043456   ;;  %vm792_vm6 = vcmask 162816   ;;  %vm799_vm7 = vcmask 158720  }
  0x1a   :  { %3412 = vmatprep.subr.bf16.mxu0 %v3828_v8  ;;  %s5414_s3 = sld [smem:[#allocation17_spill]]  ;;  %s5415_s5 = sld [smem:[#allocation14_spill]]  ;;  %v3431_v1 = vpack.c.bf16 %v601_v59, %v600_v58  ;;  %vm1029_vm8 = vcmask 257024   ;;  %vm2720_vm9 = vcmask 254976   ;;  %vm2834_vm10 = vcmask 9216  }
  0x1b   :  { %s5418_s0 = sld [smem:[#allocation6_spill]]  ;;  %s3829_s11 = smov [#allocation2]  }
  0x1c   :  { %3256 = vmatmul.mubr.msk.f32.gmra.mrb[2].mxu0 %vm101_vm0, %v91_v3  ;;  %s2842_s29 = sshll.u32 %s3829_s11, 4  ;;  %s2843_s29 = int_to_ptr.vmem [resolvable:$true] %s2842_s29 }
  0x1d   :  { %3258 = vmatprep.mubr.msk.f32.mxu0 %vm3827_vm1, %v3826_v2  ;;  %v194_v5 = vld [vmem:[%s5409_s7] sm:$0xff]  ;;  %v195_v6 = vld [vmem:[%s5409_s7 + $0x8] sm:$0xff]  ;;  %p3807_p1 = scmp.lt.s32.totalorder %s2843_s29, %s2843_s29 }
  0x1e   :  { %v3410_v7 = vpack.c.bf16 %v195_v6, %v194_v5  ;;  %v296_v9 = vld [vmem:[%s5410_s8] sm:$0xff]  ;;  %v297_v10 = vld [vmem:[%s5410_s8 + $0x8] sm:$0xff]  ;;  %v298_v25 = vld [vmem:[%s5410_s8 + $0x10] sm:$0xff] }
  0x1f   :  { %v3413_v11 = vpack.c.bf16 %v297_v10, %v296_v9  ;;  %v2850_v12 = vld [vmem:[%s5411_s6] ss:$0 sm:$0xff]  ;;  %v299_v26 = vld [vmem:[%s5410_s8 + $0x18] sm:$0xff]  ;;  %v407_v42 = vld [vmem:[%s5413_s4 + $0x8] sm:$0xff]  ;;  %s5416_s6 = sld [smem:[#allocation8_spill]] }
  0x20   :  { %3259 = vmatmul.mubr.msk.f32.gmra.mrb[4].mxu0 %vm101_vm0, %v92_v4  ;;  %3411 = vmatpush3.bf16.msra.mxu1 %v3410_v7  ;;  %v3416_v27 = vpack.c.bf16 %v299_v26, %v298_v25  ;;  %v2854_v28 = vld [vmem:[%s5412_s12] ss:$0 sm:$0xff]  ;;  %v510_v45 = vld [vmem:[%s5414_s3 + $0x8] sm:$0xff]  ;;  %v408_v47 = vld [vmem:[%s5413_s4 + $0x10] sm:$0xff]  ;;  %s5419_s12 = sld [smem:[#allocation7_spill]] }
  0x21   :  { %3282 = vmatprep.mubr.msk.f32.mxu0 %vm3827_vm1, %v3826_v2  ;;  %3418 = vmatprep.subr.bf16.mxu1 %v3828_v8  ;;  %v406_v41 = vld [vmem:[%s5413_s4] sm:$0xff]  ;;  %v409_v48 = vld [vmem:[%s5413_s4 + $0x18] sm:$0xff]  ;;  %v511_v49 = vld [vmem:[%s5414_s3 + $0x10] sm:$0xff] }
  0x22   :  { %3414 = vmatpush3.bf16.msra.mxu0 %v3413_v11  ;;  %v509_v43 = vld [vmem:[%s5414_s3] sm:$0xff]  ;;  %v3419_v44 = vpack.c.bf16 %v407_v42, %v406_v41  ;;  %v3422_v50 = vpack.c.bf16 %v409_v48, %v408_v47  ;;  %v512_v51 = vld [vmem:[%s5414_s3 + $0x18] sm:$0xff]  ;;  %v602_v4 = vld [vmem:[%s5371_s14 + $0x10] sm:$0xff] }
  0x23   :  { %3415 = vmatprep.subr.bf16.mxu0 %v3828_v8  ;;  %v3425_v46 = vpack.c.bf16 %v510_v45, %v509_v43  ;;  %v3428_v52 = vpack.c.bf16 %v512_v51, %v511_v49  ;;  %v2858_v53 = vld [vmem:[%s5415_s5] ss:$0 sm:$0xff]  ;;  %v603_v5 = vld [vmem:[%s5371_s14 + $0x18] sm:$0xff]  ;;  %s5420_s5 = sld [smem:[#allocation18_spill]] }
  0x24   :  { %v691_v51 = vld [vmem:[%s5418_s0] sm:$0xff] }
  0x25   :  { %v400_v57 = vld [vmem:[%s5416_s6] sm:$0xff]  ;;  %v401_v3 = vld [vmem:[%s5416_s6 + $0x8] sm:$0xff] }
  0x26   :  { %3417 = vmatpush3.bf16.msra.mxu0 %v3416_v27 }
  0x27   :  { %3424 = vmatprep.subr.bf16.mxu0 %v3828_v8 }
  0xeb   :  { %v177_v13 = vpop.f32.mrb[0].mxu0 }
  0xec   :  { %v178_v14 = vadd.f32 %v2850_v12, %v177_v13  ;;  %v3254_v15 = vpop.f32.mrb[1].mxu0  ;;  %v402_v13 = vld [vmem:[%s5416_s6 + $0x10] sm:$0xf] }
  0xee   :  { %v191_v16 = vmax.f32 %v178_v14, 0.0 }
  0xef   :  { %v182_v17 = vpop.f32.mrb[2].mxu0 }
  0xf0   :  { %v183_v18 = vadd.f32 %v2850_v12, %v182_v17  ;;  %v3257_v19 = vpop.f32.mrb[3].mxu0  ;;  %3266 = vmatmul.mubr.msk.f32.vlgmr.msra.gmra.mrb[0].mxu1 %vm203_vm2, %v191_v16 }
  0xf1   :  { %3268 = vmatprep.mubr.msk.f32.mxu1 %vm3827_vm1, %v3826_v2  ;;  %3420 = vmatpush3.bf16.msra.mxu1 %v3419_v44 }
  0xf2   :  { %v192_v20 = vmax.f32 %v183_v18, 0.0  ;;  %3421 = vmatprep.subr.bf16.mxu1 %v3828_v8 }
  0xf3   :  { %v187_v21 = vpop.f32.mrb[4].mxu0 }
  0xf4   :  { %v188_v22 = vadd.f32 %v2850_v12, %v187_v21  ;;  %3269 = vmatmul.mubr.msk.f32.gmra.mrb[2].mxu1 %vm203_vm2, %v192_v20  ;;  %v3260_v23 = vpop.f32.mrb[5].mxu0  ;;  %v3434_v12 = vpack.c.bf16 %v603_v5, %v602_v4  ;;  %v2866_v20 = vld [vmem:[%s5370_s13] ss:$0 sm:$0xff]  ;;  %s5417_s13 = sld [smem:[#allocation16_spill]] }
  0xf5   :  { %3271 = vmatprep.mubr.msk.f32.mxu1 %vm3827_vm1, %v3826_v2  ;;  %3423 = vmatpush3.bf16.msra.mxu1 %v3422_v50 }
  0xf6   :  { %v193_v24 = vmax.f32 %v188_v22, 0.0  ;;  %3430 = vmatprep.subr.bf16.mxu1 %v3828_v8 }
  0xf8   :  { %3272 = vmatmul.mubr.msk.f32.gmra.mrb[4].mxu1 %vm203_vm2, %v193_v24 }
  0xf9   :  { %3299 = vmatprep.mubr.msk.f32.mxu1 %vm3827_vm1, %v3826_v2 }
 0x1c3   :  { %v279_v29 = vpop.f32.mrb[0].mxu1 }
 0x1c4   :  { %v280_v30 = vadd.f32 %v2854_v28, %v279_v29  ;;  %v3267_v31 = vpop.f32.mrb[1].mxu1 }
 0x1c6   :  { %v293_v32 = vmax.f32 %v280_v30, 0.0 }
 0x1c7   :  { %v284_v33 = vpop.f32.mrb[2].mxu1 }
 0x1c8   :  { %v285_v34 = vadd.f32 %v2854_v28, %v284_v33  ;;  %v3270_v35 = vpop.f32.mrb[3].mxu1  ;;  %3283 = vmatmul.mubr.msk.f32.vlgmr.msra.gmra.mrb[6].mxu0 %vm307_vm3, %v293_v32  ;;  %v2862_v32 = vld [vmem:[%s5417_s13] ss:$0 sm:$0xff] }
 0x1c9   :  { %3285 = vmatprep.mubr.msk.f32.mxu0 %vm3827_vm1, %v3826_v2  ;;  %3426 = vmatpush3.bf16.msra.mxu0 %v3425_v46 }
 0x1ca   :  { %v294_v36 = vmax.f32 %v285_v34, 0.0  ;;  %3427 = vmatprep.subr.bf16.mxu0 %v3828_v8 }
 0x1cb   :  { %v289_v37 = vpop.f32.mrb[4].mxu1 }
 0x1cc   :  { %v290_v38 = vadd.f32 %v2854_v28, %v289_v37  ;;  %3286 = vmatmul.mubr.msk.f32.gmra.mrb[8].mxu0 %vm307_vm3, %v294_v36  ;;  %v3273_v39 = vpop.f32.mrb[5].mxu1  ;;  %v2870_v37 = vld [vmem:[%s5372_s15] ss:$0 sm:$0xff] }
 0x1cd   :  { %3288 = vmatprep.mubr.msk.f32.mxu0 %vm3827_vm1, %v3826_v2  ;;  %3429 = vmatpush3.bf16.msra.mxu0 %v3428_v52 }
 0x1ce   :  { %v295_v40 = vmax.f32 %v290_v38, 0.0  ;;  %3436 = vmatprep.subr.bf16.mxu0 %v3828_v8 }
 0x1d0   :  { %3289 = vmatmul.mubr.msk.f32.gmra.mrb[10].mxu0 %vm307_vm3, %v295_v40 }
 0x1d1   :  { %3316 = vmatprep.mubr.msk.f32.mxu0 %vm3827_vm1, %v3826_v2 }
 0x29b   :  { %v383_v54 = vpop.f32.mrb[6].mxu0 }
 0x29c   :  { %v384_v55 = vadd.f32 %v2858_v53, %v383_v54  ;;  %v3284_v56 = vpop.f32.mrb[7].mxu0 }
 0x29e   :  { %v397_v60 = vmax.f32 %v384_v55, 0.0  ;;  %v692_v55 = vld [vmem:[%s5418_s0 + $0x8] sm:$0xff] }
 0x29f   :  { %v388_v61 = vpop.f32.mrb[8].mxu0 }
 0x2a0   :  { %v4082_v62 = vadd.f32 %v400_v57, %v397_v60  ;;  %v389_v63 = vadd.f32 %v2858_v53, %v388_v61  ;;  %v3287_v0 = vpop.f32.mrb[9].mxu0  ;;  %v693_v60 = vld [vmem:[%s5418_s0 + $0x10] sm:$0xf] }
 0x2a2   :  { %v398_v6 = vmax.f32 %v389_v63, 0.0  ;;  %3300 = vmatmul.mubr.msk.f32.vlgmr.msra.gmra.mrb[6].mxu1 %vm307_vm3, %v4082_v62  ;;  %3317 = vmatmul.mubr.msk.f32.vlgmr.msra.gmra.mrb[12].mxu0 %vm307_vm3, %v4082_v62 }
 0x2a3   :  { %v393_v7 = vpop.f32.mrb[10].mxu0  ;;  %3302 = vmatprep.mubr.msk.f32.mxu1 %vm3827_vm1, %v3826_v2  ;;  %3319 = vmatprep.mubr.msk.f32.mxu0 %vm3827_vm1, %v3826_v2 }
 0x2a4   :  { %v4101_v9 = vadd.f32 %v401_v3, %v398_v6  ;;  %v394_v10 = vadd.f32 %v2858_v53, %v393_v7  ;;  %3432 = vmatpush3.bf16.msra.mxu1 %v3431_v1  ;;  %v3290_v11 = vpop.f32.mrb[11].mxu0 }
 0x2a5   :  { %3433 = vmatprep.subr.bf16.mxu1 %v3828_v8 }
 0x2a6   :  { %v399_v14 = vmax.f32 %v394_v10, 0.0  ;;  %3303 = vmatmul.mubr.msk.f32.gmra.mrb[8].mxu1 %vm307_vm3, %v4101_v9  ;;  %3320 = vmatmul.mubr.msk.f32.gmra.mrb[14].mxu0 %vm307_vm3, %v4101_v9 }
 0x2a7   :  { %3305 = vmatprep.mubr.msk.f32.mxu1 %vm3827_vm1, %v3826_v2  ;;  %3322 = vmatprep.mubr.msk.f32.mxu0 %vm3827_vm1, %v3826_v2 }
 0x2a8   :  { %v4115_v15 = vadd.f32 %v402_v13, %v399_v14  ;;  %3435 = vmatpush3.bf16.msra.mxu1 %v3434_v12 }
 0x2a9   :  { %3440 = vmatprep.subr.bf16.mxu1 %v3828_v8 }
 0x2aa   :  { %3306 = vmatmul.mubr.msk.f32.gmra.mrb[10].mxu1 %vm307_vm3, %v4115_v15  ;;  %3323 = vmatmul.mubr.msk.f32.gmra.mrb[16].mxu0 %vm307_vm3, %v4115_v15 }
 0x2ab   :  { %3333 = vmatprep.mubr.msk.f32.mxu1 %vm3827_vm1, %v3826_v2  ;;  %3348 = vmatprep.mubr.msk.f32.mxu0 %vm3827_vm1, %v3826_v2 }
 0x2ae   :  { %3334 = vmatmul.mubr.msk.f32.vlgmr.msra.gmra.mrb[12].mxu1 %vm307_vm3, %v4082_v62 }
 0x2af   :  { %3336 = vmatprep.mubr.msk.f32.mxu1 %vm3827_vm1, %v3826_v2 }
 0x2b2   :  { %3337 = vmatmul.mubr.msk.f32.gmra.mrb[14].mxu1 %vm307_vm3, %v4101_v9 }
 0x2b3   :  { %3339 = vmatprep.mubr.msk.f32.mxu1 %vm3827_vm1, %v3826_v2 }
 0x2b6   :  { %3340 = vmatmul.mubr.msk.f32.gmra.mrb[16].mxu1 %vm307_vm3, %v4115_v15 }
 0x2b7   :  { %3363 = vmatprep.mubr.msk.f32.mxu1 %vm3827_vm1, %v3826_v2 }
 0x375   :  { %v492_v16 = vpop.f32.mrb[6].mxu1  ;;  %v586_v17 = vpop.f32.mrb[12].mxu0 }
 0x376   :  { %v3301_v18 = vpop.f32.mrb[7].mxu1  ;;  %v3318_v19 = vpop.f32.mrb[13].mxu0  ;;  %v587_v23 = vadd.f32 %v2866_v20, %v586_v17  ;;  %v493_v36 = vadd.f32 %v2862_v32, %v492_v16 }
 0x378   :  { %v506_v42 = vmul.f32 0.17677669, %v493_v36 }
 0x379   :  { %v497_v21 = vpop.f32.mrb[8].mxu1  ;;  %v591_v22 = vpop.f32.mrb[14].mxu0 }
 0x37a   :  { %v592_v24 = vadd.f32 %v2866_v20, %v591_v22  ;;  %v3304_v25 = vpop.f32.mrb[9].mxu1  ;;  %v3321_v26 = vpop.f32.mrb[15].mxu0  ;;  %v498_v43 = vadd.f32 %v2862_v32, %v497_v21  ;;  %v920_v22 = vld [vmem:[%s5373_s16] sm:$0xff] }
 0x37b   :  { %v923_v26 = vld [vmem:[%s5373_s16 + $0x18] sm:$0xff] }
 0x37c   :  { %v3437_v27 = vpack.c.bf16 %v592_v24, %v587_v23  ;;  %v507_v47 = vmul.f32 0.17677669, %v498_v43  ;;  %v921_v23 = vld [vmem:[%s5373_s16 + $0x8] sm:$0xff]  ;;  %v922_v24 = vld [vmem:[%s5373_s16 + $0x10] sm:$0xff]  ;;  %v2884_v43 = vld [vmem:[%s5374_s17] ss:$0 sm:$0xff] }
 0x37d   :  { %v502_v28 = vpop.f32.mrb[10].mxu1  ;;  %v596_v29 = vpop.f32.mrb[16].mxu0  ;;  %v3444_v25 = vpack.c.bf16 %v921_v23, %v920_v22  ;;  %v1211_v22 = vld [vmem:[%s5377_s20 + $0x190] sm:$0xff] }
 0x37e   :  { %3439 = vmatpush3.bf16.xpose.msk.msra.mxu0 %vm3438_vm4, %v3437_v27  ;;  %v3307_v30 = vpop.f32.mrb[11].mxu1  ;;  %v3324_v31 = vpop.f32.mrb[17].mxu0  ;;  %v597_v34 = vadd.f32 %v2866_v20, %v596_v29  ;;  %v503_v48 = vadd.f32 %v2862_v32, %v502_v28  ;;  %v3447_v27 = vpack.c.bf16 %v923_v26, %v922_v24 }
 0x37f   :  { %3346 = vmatprep.subr.mxu0 %v3826_v2 }
 0x380   :  { %v508_v50 = vmul.f32 0.17677669, %v503_v48 }
 0x381   :  { %v677_v33 = vpop.f32.mrb[12].mxu1 }
 0x382   :  { %v3335_v35 = vpop.f32.mrb[13].mxu1  ;;  %v678_v39 = vadd.f32 %v2870_v37, %v677_v33 }
 0x385   :  { %v682_v38 = vpop.f32.mrb[14].mxu1 }
 0x386   :  { %v683_v40 = vadd.f32 %v2870_v37, %v682_v38  ;;  %v3338_v41 = vpop.f32.mrb[15].mxu1  ;;  %3347 = vmatpush3.xpose.msk.msra.mxu0 %vm307_vm3, %v597_v34 }
 0x387   :  { %3443 = vmatprep.subr.bf16.mxu0 %v3828_v8 }
 0x388   :  { %v3441_v44 = vpack.c.bf16 %v683_v40, %v678_v39 }
 0x389   :  { %v687_v45 = vpop.f32.mrb[16].mxu1  ;;  %3349 = vmatmul.mubr.msk.f32.vlgmr.msra.gmra.mrb[18].mxu0 %vm307_vm3, %v506_v42 }
 0x38a   :  { %v3341_v46 = vpop.f32.mrb[17].mxu1  ;;  %3442 = vmatpush3.bf16.msra.mxu1 %v3441_v44  ;;  %3351 = vmatprep.mubr.msk.f32.mxu0 %vm3827_vm1, %v3826_v2  ;;  %v688_v49 = vadd.f32 %v2870_v37, %v687_v45 }
 0x38b   :  { %3361 = vmatprep.subr.mxu1 %v3826_v2  ;;  %3445 = vmatpush3.bf16.msra.mxu0 %v3444_v25 }
 0x38c   :  { %3446 = vmatprep.subr.bf16.mxu0 %v3828_v8 }
 0x38d   :  { %3352 = vmatmul.mubr.msk.f32.gmra.mrb[20].mxu0 %vm307_vm3, %v507_v47 }
 0x38e   :  { %3362 = vmatpush3.msk.msra.mxu1 %vm836_vm5, %v688_v49  ;;  %3354 = vmatprep.mubr.msk.f32.mxu0 %vm3827_vm1, %v3826_v2 }
 0x38f   :  { %3449 = vmatprep.subr.bf16.mxu1 %v3828_v8  ;;  %3448 = vmatpush3.bf16.msra.mxu0 %v3447_v27 }
 0x391   :  { %3355 = vmatmul.mubr.msk.f32.gmra.mrb[22].mxu0 %vm307_vm3, %v508_v50 }
 0x392   :  { %3380 = vmatprep.mubr.msk.f32.mxu0 %vm3827_vm1, %v3826_v2 }
 0x45c   :  { %v778_v52 = vpop.f32.mrb[18].mxu0 }
 0x45d   :  { %v779_v53 = vadd.f32 %v778_v52, %v691_v51  ;;  %v3350_v54 = vpop.f32.mrb[19].mxu0 }
 0x45f   :  { %v793_v56 = vsel %vm792_vm6, %v779_v53, -inf }
 0x460   :  { %794 = vmax.xlane.f32.xlu0 %v793_v56  ;;  %v783_v57 = vpop.f32.mrb[20].mxu0 }
 0x461   :  { %v784_v58 = vadd.f32 %v783_v57, %v692_v55  ;;  %v3353_v59 = vpop.f32.mrb[21].mxu0 }
 0x463   :  { %v796_v61 = vsel %vm792_vm6, %v784_v58, -inf }
 0x464   :  { %797 = vmax.xlane.f32.xlu0 %v796_v61  ;;  %v788_v63 = vpop.f32.mrb[22].mxu0 }
 0x465   :  { %v789_v0 = vadd.f32 %v788_v63, %v693_v60  ;;  %v3356_v1 = vpop.f32.mrb[23].mxu0 }
 0x467   :  { %v800_v3 = vsel %vm799_vm7, %v789_v0, -inf }
 0x468   :  { %801 = vmax.xlane.f32.xlu1 %v800_v3 }
 0x4ed   :  { %v795_v4 = vpop.xlane.xlu0 %794 }
 0x4ee   :  { %v803_v5 = vsub.f32 %v779_v53, %v795_v4 }
 0x4f0   :  { %v806_v6 = vmul.f32 1.442695, %v803_v5 }
 0x4f1   :  { %v798_v7 = vpop.xlane.xlu0 %797 }
 0x4f2   :  { %3782 = vpow2.f32 %v806_v6  ;;  %v804_v10 = vsub.f32 %v784_v58, %v798_v7 }
 0x4f4   :  { %v808_v11 = vmul.f32 1.442695, %v804_v10 }
 0x4f5   :  { %v802_v12 = vpop.xlane.xlu1 %801 }
 0x4f6   :  { %3784 = vpow2.f32 %v808_v11  ;;  %v805_v13 = vsub.f32 %v789_v0, %v802_v12  ;;  %v1164_v11 = vld [vmem:[%s5377_s20 + $0x18] sm:$0xff] }
 0x4f7   :  { %v1180_v12 = vld [vmem:[%s5377_s20 + $0x98] sm:$0xff] }
 0x4f8   :  { %v810_v14 = vmul.f32 1.442695, %v805_v13  ;;  %v3460_v13 = vpack.c.bf16 %v1180_v12, %v1164_v11  ;;  %v1216_v11 = vld [vmem:[%s5377_s20 + $0x1b8] sm:$0xff] }
 0x4fa   :  { %3786 = vpow2.f32 %v810_v14  ;;  %v1163_v14 = vld [vmem:[%s5377_s20 + $0x10] sm:$0xff]  ;;  %3461 = vmatprep.subr.bf16.mxu0 %v3460_v13 }
 0x4fc   :  { %v3783_v16 = vpop.eup %3782 }
 0x4fd   :  { %v812_v17 = vsel %vm792_vm6, %v3783_v16, 0.0 }
 0x4fe   :  { %813 = vadd.xlane.f32.xlu1 %v812_v17 }
 0x500   :  { %v3785_v18 = vpop.eup %3784 }
 0x501   :  { %v815_v19 = vsel %vm792_vm6, %v3785_v18, 0.0 }
 0x502   :  { %816 = vadd.xlane.f32.xlu0 %v815_v19  ;;  %v1212_v19 = vld [vmem:[%s5377_s20 + $0x198] sm:$0xff] }
 0x504   :  { %v3787_v20 = vpop.eup %3786 }
 0x505   :  { %v818_v21 = vsel %vm799_vm7, %v3787_v20, 0.0 }
 0x506   :  { %819 = vadd.xlane.f32.xlu1 %v818_v21  ;;  %v1195_v21 = vld [vmem:[%s5377_s20 + $0x110] sm:$0xff] }
 0x507   :  { %v3466_v23 = vpack.c.bf16 %v1211_v22, %v1195_v21  ;;  %v1170_v21 = vld [vmem:[%s5377_s20 + $0x48] sm:$0xff] }
 0x58b   :  { %v814_v28 = vpop.xlane.xlu1 %813 }
 0x58c   :  { %3788 = vrcp.f32 %v814_v28 }
 0x58f   :  { %v817_v29 = vpop.xlane.xlu0 %816 }
 0x590   :  { %3790 = vrcp.f32 %v817_v29 }
 0x593   :  { %v820_v30 = vpop.xlane.xlu1 %819 }
 0x594   :  { %3792 = vrcp.f32 %v820_v30 }
 0x596   :  { %v3789_v31 = vpop.eup %3788 }
 0x597   :  { %v824_v32 = vmul.f32 %v3789_v31, %v3783_v16  ;;  %v1179_v16 = vld [vmem:[%s5377_s20 + $0x90] sm:$0xff] }
 0x598   :  { %v3462_v17 = vpack.c.bf16 %v1179_v16, %v1163_v14  ;;  %v1197_v14 = vld [vmem:[%s5377_s20 + $0x120] sm:$0xff] }
 0x599   :  { %3364 = vmatmul.mubr.msk.f32.vlgmr.msra.gmra.mrb[18].mxu1 %vm792_vm6, %v824_v32  ;;  %v1213_v16 = vld [vmem:[%s5377_s20 + $0x1a0] sm:$0xff] }
 0x59a   :  { %v3791_v33 = vpop.eup %3790  ;;  %3366 = vmatprep.mubr.msk.f32.mxu1 %vm3827_vm1, %v3826_v2 }
 0x59b   :  { %v825_v34 = vmul.f32 %v3791_v33, %v3785_v18  ;;  %v1196_v18 = vld [vmem:[%s5377_s20 + $0x118] sm:$0xff] }
 0x59d   :  { %3367 = vmatmul.mubr.msk.f32.gmra.mrb[20].mxu1 %vm792_vm6, %v825_v34 }
 0x59e   :  { %v3793_v35 = vpop.eup %3792  ;;  %3369 = vmatprep.mubr.msk.f32.mxu1 %vm3827_vm1, %v3826_v2 }
 0x59f   :  { %v826_v36 = vmul.f32 %v3793_v35, %v3787_v20  ;;  %v3464_v20 = vpack.c.bf16 %v1212_v19, %v1196_v18  ;;  %v2888_v35 = vld [vmem:[%s5375_s18] ss:$0 sm:$0xff]  ;;  %v1199_v19 = vld [vmem:[%s5377_s20 + $0x130] sm:$0xff] }
 0x5a1   :  { %3370 = vmatmul.mubr.msk.f32.gmra.mrb[22].mxu1 %vm792_vm6, %v826_v36 }
 0x5a2   :  { %3395 = vmatprep.mubr.msk.f32.mxu1 %vm3827_vm1, %v3826_v2 }
 0x66c   :  { %v906_v37 = vpop.f32.mrb[18].mxu1 }
 0x66d   :  { %v3365_v38 = vpop.f32.mrb[19].mxu1  ;;  %3381 = vmatmul.mubr.msk.f32.vlgmr.msra.gmra.mrb[24].mxu0 %vm307_vm3, %v906_v37 }
 0x66e   :  { %3383 = vmatprep.mubr.msk.f32.mxu0 %vm3827_vm1, %v3826_v2  ;;  %3463 = vmatpush1.bf16.msra.mxu0 %v3462_v17 }
 0x66f   :  { %3465 = vmatprep.subr.bf16.mxu0 %v3464_v20  ;;  %v1215_v20 = vld [vmem:[%s5377_s20 + $0x1b0] sm:$0xff] }
 0x670   :  { %v911_v39 = vpop.f32.mrb[20].mxu1 }
 0x671   :  { %v3368_v40 = vpop.f32.mrb[21].mxu1  ;;  %3384 = vmatmul.mubr.msk.f32.gmra.mrb[26].mxu0 %vm307_vm3, %v911_v39  ;;  %v2889_v39 = vld [vmem:[%s5376_s19] ss:$0 sm:$0xff] }
 0x672   :  { %3386 = vmatprep.mubr.msk.f32.mxu0 %vm3827_vm1, %v3826_v2  ;;  %3467 = vmatpush1.bf16.msra.mxu0 %v3466_v23  ;;  %v1186_v23 = vld [vmem:[%s5377_s20 + $0xc8] sm:$0xff] }
 0x674   :  { %v916_v41 = vpop.f32.mrb[22].mxu1 }
 0x675   :  { %v3371_v42 = vpop.f32.mrb[23].mxu1  ;;  %3387 = vmatmul.mubr.msk.f32.gmra.mrb[28].mxu0 %vm307_vm3, %v916_v41 }
 0x676   :  { %1447 = vmatprep.mubr.f32.mxu0 %v3826_v2 }
 0x740   :  { %v1006_v44 = vpop.f32.mrb[24].mxu0 }
 0x741   :  { %v1007_v45 = vadd.f32 %v2884_v43, %v1006_v44  ;;  %v3382_v46 = vpop.f32.mrb[25].mxu0 }
 0x743   :  { %v1020_v47 = vadd.f32 %v1007_v45, %v4082_v62 }
 0x744   :  { %v1011_v48 = vpop.f32.mrb[26].mxu0 }
 0x745   :  { %v1012_v49 = vadd.f32 %v2884_v43, %v1011_v48  ;;  %v3385_v50 = vpop.f32.mrb[27].mxu0  ;;  %v1023_v51 = vsel %vm307_vm3, %v1020_v47, 0.0  ;;  %v1178_v48 = vld [vmem:[%s5377_s20 + $0x88] sm:$0xff] }
 0x746   :  { %1024 = vadd.xlane.f32.xlu0 %v1023_v51  ;;  %v1177_v50 = vld [vmem:[%s5377_s20 + $0x80] sm:$0xff]  ;;  %v1194_v51 = vld [vmem:[%s5377_s20 + $0x108] sm:$0xff] }
 0x747   :  { %v1021_v52 = vadd.f32 %v1012_v49, %v4101_v9  ;;  %v1161_v49 = vld [vmem:[%s5377_s20] sm:$0xff] }
 0x748   :  { %v1016_v53 = vpop.f32.mrb[28].mxu0 }
 0x749   :  { %v1017_v54 = vadd.f32 %v2884_v43, %v1016_v53  ;;  %v3388_v55 = vpop.f32.mrb[29].mxu0  ;;  %v1026_v56 = vsel %vm307_vm3, %v1021_v52, 0.0 }
 0x74a   :  { %1027 = vadd.xlane.f32.xlu1 %v1026_v56  ;;  %v1084_v55 = vld [vmem:[%s5419_s12] sm:$0x3]  ;;  %v3454_v56 = vpack.c.bf16 %v1177_v50, %v1161_v49  ;;  %v1176_v49 = vld [vmem:[%s5377_s20 + $0x78] sm:$0xff] }
 0x74b   :  { %v1022_v57 = vadd.f32 %v1017_v54, %v4115_v15  ;;  %v1192_v50 = vld [vmem:[%s5377_s20 + $0xf8] sm:$0xff] }
 0x74d   :  { %v1030_v58 = vsel %vm1029_vm8, %v1022_v57, 0.0 }
 0x74e   :  { %1031 = vadd.xlane.f32.xlu0 %v1030_v58  ;;  %v1193_v58 = vld [vmem:[%s5377_s20 + $0x100] sm:$0xff] }
 0x7d3   :  { %v1025_v62 = vpop.xlane.xlu0 %1024 }
 0x7d4   :  { %v1034_v59 = vmul.f32 0.03125, %v1025_v62  ;;  %v1209_v62 = vld [vmem:[%s5377_s20 + $0x180] sm:$0xff] }
 0x7d6   :  { %v1037_v60 = vsub.f32 %v1020_v47, %v1034_v59  ;;  %v1162_v47 = vld [vmem:[%s5377_s20 + $0x8] sm:$0xff]  ;;  %v3458_v59 = vpack.c.bf16 %v1209_v62, %v1193_v58  ;;  %v1191_v58 = vld [vmem:[%s5377_s20 + $0xf0] sm:$0xff] }
 0x7d7   :  { %v1028_v61 = vpop.xlane.xlu1 %1027  ;;  %v3452_v53 = vpack.c.bf16 %v1178_v48, %v1162_v47  ;;  %v1174_v47 = vld [vmem:[%s5377_s20 + $0x68] sm:$0xff] }
 0x7d8   :  { %v1035_v63 = vmul.f32 0.03125, %v1028_v61  ;;  %v1040_v0 = vmul.f32 %v1037_v60, %v1037_v60  ;;  %v1182_v61 = vld [vmem:[%s5377_s20 + $0xa8] sm:$0xff] }
 0x7d9   :  { %v1190_v48 = vld [vmem:[%s5377_s20 + $0xe8] sm:$0xff] }
 0x7da   :  { %v1038_v1 = vsub.f32 %v1021_v52, %v1035_v63  ;;  %v1043_v9 = vsel %vm307_vm3, %v1040_v0, 0.0  ;;  %v1210_v52 = vld [vmem:[%s5377_s20 + $0x188] sm:$0xff]  ;;  %v1168_v63 = vld [vmem:[%s5377_s20 + $0x38] sm:$0xff] }
 0x7db   :  { %1044 = vadd.xlane.f32.xlu1 %v1043_v9  ;;  %v1032_v3 = vpop.xlane.xlu0 %1031  ;;  %v1206_v62 = vld [vmem:[%s5377_s20 + $0x168] sm:$0xff] }
 0x7dc   :  { %v1036_v4 = vmul.f32 0.03125, %v1032_v3  ;;  %v1041_v5 = vmul.f32 %v1038_v1, %v1038_v1  ;;  %v1165_v3 = vld [vmem:[%s5377_s20 + $0x20] sm:$0xff] }
 0x7de   :  { %v1039_v6 = vsub.f32 %v1022_v57, %v1036_v4  ;;  %v1046_v7 = vsel %vm307_vm3, %v1041_v5, 0.0  ;;  %v3456_v57 = vpack.c.bf16 %v1210_v52, %v1194_v51  ;;  %v1181_v4 = vld [vmem:[%s5377_s20 + $0xa0] sm:$0xff]  ;;  %v1167_v5 = vld [vmem:[%s5377_s20 + $0x30] sm:$0xff] }
 0x7df   :  { %1047 = vadd.xlane.f32.xlu0 %v1046_v7  ;;  %v1198_v7 = vld [vmem:[%s5377_s20 + $0x128] sm:$0xff]  ;;  %v3470_v12 = vpack.c.bf16 %v1181_v4, %v1165_v3 }
 0x7e0   :  { %v1042_v15 = vmul.f32 %v1039_v6, %v1039_v6 }
 0x7e2   :  { %v1049_v10 = vsel %vm1029_vm8, %v1042_v15, 0.0  ;;  %v1214_v15 = vld [vmem:[%s5377_s20 + $0x1a8] sm:$0xff] }
 0x7e3   :  { %1050 = vadd.xlane.f32.xlu1 %v1049_v10  ;;  %v1200_v10 = vld [vmem:[%s5377_s20 + $0x138] sm:$0xff]  ;;  %v3472_v17 = vpack.c.bf16 %v1214_v15, %v1198_v7  ;;  %v1912_v7 = vld [vmem:[%s5379_s22 + $0x80] sm:$0xff]  ;;  %v1913_v15 = vld [vmem:[%s5379_s22 + $0x88] sm:$0xff] }
 0x7e4   :  { %v3480_v18 = vpack.c.bf16 %v1216_v11, %v1200_v10  ;;  %v1944_v10 = vld [vmem:[%s5379_s22 + $0x180] sm:$0xff]  ;;  %v1945_v11 = vld [vmem:[%s5379_s22 + $0x188] sm:$0xff] }
 0x868   :  { %v1045_v24 = vpop.xlane.xlu1 %1044 }
 0x869   :  { %v1052_v25 = vmul.f32 0.03125, %v1045_v24  ;;  %v1172_v24 = vld [vmem:[%s5377_s20 + $0x58] sm:$0xff] }
 0x86b   :  { %v1055_v26 = vadd.f32 1e-05, %v1052_v25  ;;  %v1188_v25 = vld [vmem:[%s5377_s20 + $0xd8] sm:$0xff] }
 0x86c   :  { %v1048_v27 = vpop.xlane.xlu0 %1047 }
 0x86d   :  { %3794 = vrsqrt.f32 %v1055_v26  ;;  %v1053_v28 = vmul.f32 0.03125, %v1048_v27  ;;  %v3474_v27 = vpack.c.bf16 %v1213_v16, %v1197_v14  ;;  %v1896_v14 = vld [vmem:[%s5379_s22] sm:$0xff]  ;;  %v1897_v16 = vld [vmem:[%s5379_s22 + $0x8] sm:$0xff] }
 0x86f   :  { %v1056_v29 = vadd.f32 1e-05, %v1053_v28  ;;  %v3482_v28 = vpack.c.bf16 %v1215_v20, %v1199_v19  ;;  %v1928_v19 = vld [vmem:[%s5379_s22 + $0x100] sm:$0xff]  ;;  %v1929_v20 = vld [vmem:[%s5379_s22 + $0x108] sm:$0xff] }
 0x870   :  { %v1051_v30 = vpop.xlane.xlu1 %1050 }
 0x871   :  { %3796 = vrsqrt.f32 %v1056_v29  ;;  %v1054_v31 = vmul.f32 0.03125, %v1051_v30  ;;  %v1169_v29 = vld [vmem:[%s5377_s20 + $0x40] sm:$0xff] }
 0x872   :  { %v1185_v30 = vld [vmem:[%s5377_s20 + $0xc0] sm:$0xff] }
 0x873   :  { %v1057_v32 = vadd.f32 1e-05, %v1054_v31  ;;  %v3484_v31 = vpack.c.bf16 %v1186_v23, %v1170_v21  ;;  %v1914_v21 = vld [vmem:[%s5379_s22 + $0x90] sm:$0xff]  ;;  %v1915_v23 = vld [vmem:[%s5379_s22 + $0x98] sm:$0xff] }
 0x875   :  { %3798 = vrsqrt.f32 %v1057_v32  ;;  %v3492_v32 = vpack.c.bf16 %v1188_v25, %v1172_v24  ;;  %v1946_v24 = vld [vmem:[%s5379_s22 + $0x190] sm:$0xff]  ;;  %v1947_v25 = vld [vmem:[%s5379_s22 + $0x198] sm:$0xff] }
 0x877   :  { %v3795_v33 = vpop.eup %3794 }
 0x878   :  { %v1061_v34 = vmul.f32 %v3795_v33, %v1037_v60  ;;  %v1166_v60 = vld [vmem:[%s5377_s20 + $0x28] sm:$0xff]  ;;  %v1171_v33 = vld [vmem:[%s5377_s20 + $0x50] sm:$0xff] }
 0x879   :  { %v3468_v0 = vpack.c.bf16 %v1182_v61, %v1166_v60  ;;  %v1208_v60 = vld [vmem:[%s5377_s20 + $0x178] sm:$0xff] }
 0x87a   :  { %v1071_v38 = vmul.f32 %v2888_v35, %v1061_v34  ;;  %v1187_v34 = vld [vmem:[%s5377_s20 + $0xd0] sm:$0xff]  ;;  %v1224_v61 = vld [vmem:[%s5377_s20 + $0x1f8] sm:$0xff] }
 0x87b   :  { %v3797_v36 = vpop.eup %3796  ;;  %v3512_v4 = vpack.c.bf16 %v1224_v61, %v1208_v60  ;;  %v1953_v60 = vld [vmem:[%s5379_s22 + $0x1c8] sm:$0xff] }
 0x87c   :  { %v1062_v37 = vmul.f32 %v3797_v36, %v1038_v1  ;;  %v1081_v43 = vadd.f32 %v2889_v39, %v1071_v38  ;;  %v1184_v1 = vld [vmem:[%s5377_s20 + $0xb8] sm:$0xff]  ;;  %v1218_v36 = vld [vmem:[%s5377_s20 + $0x1c8] sm:$0xff] }
 0x87d   :  { %v3476_v9 = vpack.c.bf16 %v1184_v1, %v1168_v63  ;;  %v1220_v38 = vld [vmem:[%s5377_s20 + $0x1d8] sm:$0xff]  ;;  %v1205_v1 = vld [vmem:[%s5377_s20 + $0x160] sm:$0xff] }
 0x87e   :  { %v1072_v40 = vmul.f32 %v2888_v35, %v1062_v37  ;;  %v1204_v37 = vld [vmem:[%s5377_s20 + $0x158] sm:$0xff] }
 0x87f   :  { %v3799_v41 = vpop.eup %3798  ;;  %3477 = vmatprep.subr.bf16.mxu0 %v3476_v9  ;;  %v1221_v9 = vld [vmem:[%s5377_s20 + $0x1e0] sm:$0xff] }
 0x880   :  { %v1063_v42 = vmul.f32 %v3799_v41, %v1039_v6  ;;  %v1082_v44 = vadd.f32 %v2889_v39, %v1072_v40  ;;  %v1183_v6 = vld [vmem:[%s5377_s20 + $0xb0] sm:$0xff]  ;;  %v3494_v40 = vpack.c.bf16 %v1187_v34, %v1171_v33  ;;  %v1201_v41 = vld [vmem:[%s5377_s20 + $0x140] sm:$0xff]  ;;  %v1931_v33 = vld [vmem:[%s5379_s22 + $0x118] sm:$0xff] }
 0x881   :  { %v3478_v13 = vpack.c.bf16 %v1183_v6, %v1167_v5  ;;  %v1207_v5 = vld [vmem:[%s5377_s20 + $0x170] sm:$0xff]  ;;  %v1916_v34 = vld [vmem:[%s5379_s22 + $0xa0] sm:$0xff] }
 0x882   :  { %v3450_v45 = vpack.c.bf16 %v1082_v44, %v1081_v43  ;;  %v1073_v46 = vmul.f32 %v2888_v35, %v1063_v42  ;;  %v1202_v35 = vld [vmem:[%s5377_s20 + $0x148] sm:$0xff]  ;;  %v1217_v42 = vld [vmem:[%s5377_s20 + $0x1c0] sm:$0xff]  ;;  %v3496_v44 = vpack.c.bf16 %v1220_v38, %v1204_v37  ;;  %v1223_v6 = vld [vmem:[%s5377_s20 + $0x1f0] sm:$0xff] }
 0x883   :  { %v3488_v43 = vpack.c.bf16 %v1218_v36, %v1202_v35  ;;  %v3490_v51 = vpack.c.bf16 %v1217_v42, %v1201_v41  ;;  %v1917_v35 = vld [vmem:[%s5379_s22 + $0xa8] sm:$0xff]  ;;  %v1948_v36 = vld [vmem:[%s5379_s22 + $0x1a0] sm:$0xff] }
 0x884   :  { %3451 = vmatpush3.bf16.msra.mxu1 %v3450_v45  ;;  %v1083_v54 = vadd.f32 %v2889_v39, %v1073_v46  ;;  %v3486_v39 = vpack.c.bf16 %v1185_v30, %v1169_v29  ;;  %v1203_v45 = vld [vmem:[%s5377_s20 + $0x150] sm:$0xff]  ;;  %v1899_v29 = vld [vmem:[%s5379_s22 + $0x18] sm:$0xff]  ;;  %v3520_v30 = vpack.c.bf16 %v1915_v23, %v1914_v21  ;;  %v1949_v37 = vld [vmem:[%s5379_s22 + $0x1a8] sm:$0xff]  ;;  %v3524_v42 = vpack.c.bf16 %v1917_v35, %v1916_v34 }
 0x885   :  { %3393 = vmatprep.subr.mxu1 %v3826_v2  ;;  %v1219_v46 = vld [vmem:[%s5377_s20 + $0x1d0] sm:$0xff]  ;;  %v1901_v41 = vld [vmem:[%s5379_s22 + $0x28] sm:$0xff]  ;;  %v1956_v23 = vld [vmem:[%s5379_s22 + $0x1e0] sm:$0xff] }
 0x886   :  { %v3498_v52 = vpack.c.bf16 %v1219_v46, %v1203_v45  ;;  %v1933_v45 = vld [vmem:[%s5379_s22 + $0x128] sm:$0xff]  ;;  %v1918_v46 = vld [vmem:[%s5379_s22 + $0xb0] sm:$0xff] }
 0x887   :  { %v1925_v21 = vld [vmem:[%s5379_s22 + $0xe8] sm:$0xff]  ;;  %v1926_v35 = vld [vmem:[%s5379_s22 + $0xf0] sm:$0xff] }
 0x888   :  { %3394 = vmatpush3.msk.msra.mxu1 %vm836_vm5, %v1083_v54  ;;  %v1189_v54 = vld [vmem:[%s5377_s20 + $0xe0] sm:$0xff] }
 0x889   :  { %3396 = vmatmul.mubr.msk.f32.vlgmr.msra.gmra.mrb[24].mxu1 %vm792_vm6, %v1084_v55  ;;  %3453 = vmatprep.subr.bf16.mxu1 %v3452_v53  ;;  %v1173_v53 = vld [vmem:[%s5377_s20 + $0x60] sm:$0xff]  ;;  %v3500_v55 = vpack.c.bf16 %v1190_v48, %v1174_v47  ;;  %v1919_v47 = vld [vmem:[%s5379_s22 + $0xb8] sm:$0xff]  ;;  %v1950_v48 = vld [vmem:[%s5379_s22 + $0x1b0] sm:$0xff] }
 0x88a   :  { %3455 = vmatpush1.bf16.msra.mxu1 %v3454_v56  ;;  %1376 = vmatprep.mubr.f32.mxu1 %v3826_v2  ;;  %v3508_v56 = vpack.c.bf16 %v1192_v50, %v1176_v49  ;;  %v3502_v63 = vpack.c.bf16 %v1189_v54, %v1173_v53  ;;  %v1951_v49 = vld [vmem:[%s5379_s22 + $0x1b8] sm:$0xff]  ;;  %v3528_v54 = vpack.c.bf16 %v1919_v47, %v1918_v46  ;;  %v1976_v47 = vld [vmem:[%s5379_s22 + $0x280] sm:$0xff] }
 0x88b   :  { %3457 = vmatprep.subr.bf16.mxu1 %v3456_v57  ;;  %v1175_v57 = vld [vmem:[%s5377_s20 + $0x70] sm:$0xff]  ;;  %v1903_v53 = vld [vmem:[%s5379_s22 + $0x38] sm:$0xff] }
 0x88e   :  { %3459 = vmatpush1.bf16.msra.mxu1 %v3458_v59  ;;  %v1222_v59 = vld [vmem:[%s5377_s20 + $0x1e8] sm:$0xff] }
 0x88f   :  { %3469 = vmatprep.subr.bf16.mxu1 %v3468_v0  ;;  %v3510_v0 = vpack.c.bf16 %v1191_v58, %v1175_v57  ;;  %v3504_v3 = vpack.c.bf16 %v1222_v59, %v1206_v62  ;;  %v1935_v57 = vld [vmem:[%s5379_s22 + $0x138] sm:$0xff]  ;;  %v1920_v58 = vld [vmem:[%s5379_s22 + $0xc0] sm:$0xff]  ;;  %v1921_v62 = vld [vmem:[%s5379_s22 + $0xc8] sm:$0xff] }
 0x890   :  { %v1952_v59 = vld [vmem:[%s5379_s22 + $0x1c0] sm:$0xff] }
 0x95c   :  { %v4333_v22 = vpop.f32.mrb[24].mxu1 }
 0x95d   :  { %2892 = vmatmul.mubr.msk.f32.vlgmr.msra.gmra.mrb[26].mxu1 %vm307_vm3, %v4333_v22  ;;  %2893 = vmatmul.mubr.msk.f32.vlgmr.msra.gmra.mrb[30].mxu0 %vm307_vm3, %v4333_v22  ;;  %v3397_v26 = vpop.f32.mrb[25].mxu1 }
 0x95e   :  { %3471 = vmatpush1.bf16.msra.mxu1 %v3470_v12  ;;  %3479 = vmatpush1.bf16.msra.mxu0 %v3478_v13  ;;  %v3506_v12 = vpack.c.bf16 %v1221_v9, %v1205_v1  ;;  %v3514_v13 = vpack.c.bf16 %v1223_v6, %v1207_v5  ;;  %v3518_v26 = vpack.c.bf16 %v1897_v16, %v1896_v14  ;;  %v1905_v1 = vld [vmem:[%s5379_s22 + $0x48] sm:$0xff]  ;;  %v1922_v6 = vld [vmem:[%s5379_s22 + $0xd0] sm:$0xff]  ;;  %v1907_v14 = vld [vmem:[%s5379_s22 + $0x58] sm:$0xff] }
 0x95f   :  { %3473 = vmatprep.subr.bf16.mxu1 %v3472_v17  ;;  %3481 = vmatprep.subr.bf16.mxu0 %v3480_v18  ;;  %v3516_v17 = vpack.c.bf16 %v1913_v15, %v1912_v7  ;;  %v3548_v18 = vpack.c.bf16 %v1945_v11, %v1944_v10  ;;  %v3532_v9 = vpack.c.bf16 %v1921_v62, %v1920_v58  ;;  %v1937_v5 = vld [vmem:[%s5379_s22 + $0x148] sm:$0xff]  ;;  %v1923_v7 = vld [vmem:[%s5379_s22 + $0xd8] sm:$0xff]  ;;  %v1954_v15 = vld [vmem:[%s5379_s22 + $0x1d0] sm:$0xff] }
 0x960   :  { %1518 = vmatprep.mubr.f32.mxu1 %v3826_v2  ;;  %1589 = vmatprep.mubr.f32.mxu0 %v3826_v2  ;;  %v1955_v10 = vld [vmem:[%s5379_s22 + $0x1d8] sm:$0xff]  ;;  %v3536_v16 = vpack.c.bf16 %v1923_v7, %v1922_v6  ;;  %v1961_v6 = vld [vmem:[%s5379_s22 + $0x208] sm:$0xff] }
 0x962   :  { %3475 = vmatpush1.bf16.msra.mxu1 %v3474_v27  ;;  %3483 = vmatpush1.bf16.msra.mxu0 %v3482_v28  ;;  %v3550_v27 = vpack.c.bf16 %v1929_v20, %v1928_v19  ;;  %v1898_v28 = vld [vmem:[%s5379_s22 + $0x10] sm:$0xff]  ;;  %v1939_v19 = vld [vmem:[%s5379_s22 + $0x158] sm:$0xff]  ;;  %v1924_v20 = vld [vmem:[%s5379_s22 + $0xe0] sm:$0xff] }
 0x963   :  { %3485 = vmatprep.subr.bf16.mxu1 %v3484_v31  ;;  %3493 = vmatprep.subr.bf16.mxu0 %v3492_v32  ;;  %v3552_v31 = vpack.c.bf16 %v1947_v25, %v1946_v24  ;;  %v1930_v32 = vld [vmem:[%s5379_s22 + $0x110] sm:$0xff]  ;;  %v3522_v38 = vpack.c.bf16 %v1899_v29, %v1898_v28  ;;  %v1957_v24 = vld [vmem:[%s5379_s22 + $0x1e8] sm:$0xff]  ;;  %v3540_v28 = vpack.c.bf16 %v1925_v21, %v1924_v20  ;;  %v1979_v20 = vld [vmem:[%s5379_s22 + $0x298] sm:$0xff] }
 0x964   :  { %v3572_v29 = vpack.c.bf16 %v1957_v24, %v1956_v23  ;;  %v2010_v21 = vld [vmem:[%s5379_s22 + $0x390] sm:$0xff]  ;;  %v2011_v23 = vld [vmem:[%s5379_s22 + $0x398] sm:$0xff] }
 0x965   :  { %2894 = vmatmul.mubr.msk.f32.vlgmr.msra.gmra.mrb[28].mxu1 %vm307_vm3, %v4333_v22  ;;  %2895 = vmatmul.mubr.msk.f32.vlgmr.msra.gmra.mrb[32].mxu0 %vm307_vm3, %v4333_v22 }
 0x966   :  { %3487 = vmatpush1.bf16.msra.mxu1 %v3486_v39  ;;  %3495 = vmatpush1.bf16.msra.mxu0 %v3494_v40  ;;  %v3554_v39 = vpack.c.bf16 %v1931_v33, %v1930_v32  ;;  %v1900_v40 = vld [vmem:[%s5379_s22 + $0x20] sm:$0xff]  ;;  %v1941_v32 = vld [vmem:[%s5379_s22 + $0x168] sm:$0xff] }
 0x967   :  { %3489 = vmatprep.subr.bf16.mxu1 %v3488_v43  ;;  %3497 = vmatprep.subr.bf16.mxu0 %v3496_v44  ;;  %v3556_v43 = vpack.c.bf16 %v1949_v37, %v1948_v36  ;;  %v1932_v44 = vld [vmem:[%s5379_s22 + $0x120] sm:$0xff]  ;;  %v3526_v50 = vpack.c.bf16 %v1901_v41, %v1900_v40  ;;  %v1927_v36 = vld [vmem:[%s5379_s22 + $0xf8] sm:$0xff]  ;;  %v1958_v37 = vld [vmem:[%s5379_s22 + $0x1f0] sm:$0xff] }
 0x968   :  { %1660 = vmatprep.mubr.f32.mxu1 %v3826_v2  ;;  %1731 = vmatprep.mubr.f32.mxu0 %v3826_v2  ;;  %v1910_v40 = vld [vmem:[%s5379_s22 + $0x70] sm:$0xff]  ;;  %v1911_v41 = vld [vmem:[%s5379_s22 + $0x78] sm:$0xff] }
 0x96a   :  { %3491 = vmatpush1.bf16.msra.mxu1 %v3490_v51  ;;  %3499 = vmatpush1.bf16.msra.mxu0 %v3498_v52  ;;  %v3558_v51 = vpack.c.bf16 %v1933_v45, %v1932_v44  ;;  %v1902_v52 = vld [vmem:[%s5379_s22 + $0x30] sm:$0xff]  ;;  %v1943_v45 = vld [vmem:[%s5379_s22 + $0x178] sm:$0xff] }
 0x96b   :  { %3501 = vmatprep.subr.bf16.mxu1 %v3500_v55  ;;  %3509 = vmatprep.subr.bf16.mxu0 %v3508_v56  ;;  %v3560_v55 = vpack.c.bf16 %v1951_v49, %v1950_v48  ;;  %v1934_v56 = vld [vmem:[%s5379_s22 + $0x130] sm:$0xff]  ;;  %v3530_v61 = vpack.c.bf16 %v1903_v53, %v1902_v52  ;;  %v1977_v48 = vld [vmem:[%s5379_s22 + $0x288] sm:$0xff]  ;;  %v2008_v49 = vld [vmem:[%s5379_s22 + $0x380] sm:$0xff]  ;;  %v1229_v53 = vlaneseq }
 0x96c   :  { %v1942_v44 = vld [vmem:[%s5379_s22 + $0x170] sm:$0xff] }
 0x96d   :  { %2896 = vmatmul.mubr.msk.f32.vlgmr.msra.gmra.mrb[30].mxu1 %vm307_vm3, %v4333_v22  ;;  %2897 = vmatmul.mubr.msk.f32.vlgmr.msra.gmra.mrb[34].mxu0 %vm307_vm3, %v4333_v22  ;;  %v3578_v46 = vpack.c.bf16 %v1943_v45, %v1942_v44 }
 0x96e   :  { %3503 = vmatpush1.bf16.msra.mxu1 %v3502_v63  ;;  %3511 = vmatpush1.bf16.msra.mxu0 %v3510_v0  ;;  %v3562_v63 = vpack.c.bf16 %v1935_v57, %v1934_v56  ;;  %v1904_v0 = vld [vmem:[%s5379_s22 + $0x40] sm:$0xff]  ;;  %v4660_v56 = vld [vmem:[%s5378_s21 + $0x8] sm:$0xff] }
 0x96f   :  { %3505 = vmatprep.subr.bf16.mxu1 %v3504_v3  ;;  %3513 = vmatprep.subr.bf16.mxu0 %v3512_v4  ;;  %v3564_v3 = vpack.c.bf16 %v1953_v60, %v1952_v59  ;;  %v1936_v4 = vld [vmem:[%s5379_s22 + $0x140] sm:$0xff]  ;;  %v3534_v11 = vpack.c.bf16 %v1905_v1, %v1904_v0 }
 0x970   :  { %1802 = vmatprep.mubr.f32.mxu1 %v3826_v2  ;;  %1873 = vmatprep.mubr.f32.mxu0 %v3826_v2  ;;  %v4672_v59 = vld [vmem:[%s5378_s21] sm:$0xff] }
 0x972   :  { %3507 = vmatpush1.bf16.msra.mxu1 %v3506_v12  ;;  %3515 = vmatpush1.bf16.msra.mxu0 %v3514_v13  ;;  %v3566_v12 = vpack.c.bf16 %v1937_v5, %v1936_v4  ;;  %v1906_v13 = vld [vmem:[%s5379_s22 + $0x50] sm:$0xff]  ;;  %v1960_v5 = vld [vmem:[%s5379_s22 + $0x200] sm:$0xff] }
 0x973   :  { %3517 = vmatprep.subr.bf16.mxu1 %v3516_v17  ;;  %3549 = vmatprep.subr.bf16.mxu0 %v3548_v18  ;;  %v3568_v17 = vpack.c.bf16 %v1955_v10, %v1954_v15  ;;  %v1938_v18 = vld [vmem:[%s5379_s22 + $0x150] sm:$0xff]  ;;  %v3538_v25 = vpack.c.bf16 %v1907_v14, %v1906_v13  ;;  %v1993_v13 = vld [vmem:[%s5379_s22 + $0x308] sm:$0xff] }
 0x974   :  { %v1978_v14 = vld [vmem:[%s5379_s22 + $0x290] sm:$0xff] }
 0x975   :  { %2898 = vmatmul.mubr.msk.f32.vlgmr.msra.gmra.mrb[32].mxu1 %vm307_vm3, %v4333_v22  ;;  %2899 = vmatmul.mubr.msk.f32.vlgmr.msra.gmra.mrb[36].mxu0 %vm307_vm3, %v4333_v22 }
 0x976   :  { %3519 = vmatpush3.bf16.msra.mxu1 %v3518_v26  ;;  %3551 = vmatpush3.bf16.msra.mxu0 %v3550_v27  ;;  %v3570_v26 = vpack.c.bf16 %v1939_v19, %v1938_v18  ;;  %v1908_v27 = vld [vmem:[%s5379_s22 + $0x60] sm:$0xff] }
 0x977   :  { %3521 = vmatprep.subr.bf16.mxu1 %v3520_v30  ;;  %3553 = vmatprep.subr.bf16.mxu0 %v3552_v31  ;;  %v1909_v30 = vld [vmem:[%s5379_s22 + $0x68] sm:$0xff]  ;;  %v1940_v31 = vld [vmem:[%s5379_s22 + $0x160] sm:$0xff] }
 0x978   :  { %v3542_v33 = vpack.c.bf16 %v1909_v30, %v1908_v27  ;;  %v3574_v34 = vpack.c.bf16 %v1941_v32, %v1940_v31  ;;  %v3584_v32 = vpack.c.bf16 %v1979_v20, %v1978_v14  ;;  %v1984_v20 = vld [vmem:[%s5379_s22 + $0x2c0] sm:$0xff] }
 0x97a   :  { %3523 = vmatpush3.bf16.msra.mxu1 %v3522_v38  ;;  %3555 = vmatpush3.bf16.msra.mxu0 %v3554_v39  ;;  %v3544_v38 = vpack.c.bf16 %v1927_v36, %v1926_v35  ;;  %v1959_v39 = vld [vmem:[%s5379_s22 + $0x1f8] sm:$0xff]  ;;  %v1980_v36 = vld [vmem:[%s5379_s22 + $0x2a0] sm:$0xff] }
 0x97b   :  { %3525 = vmatprep.subr.bf16.mxu1 %v3524_v42  ;;  %3557 = vmatprep.subr.bf16.mxu0 %v3556_v43  ;;  %v3576_v42 = vpack.c.bf16 %v1959_v39, %v1958_v37  ;;  %v3546_v43 = vpack.c.bf16 %v1911_v41, %v1910_v40  ;;  %v1995_v35 = vld [vmem:[%s5379_s22 + $0x318] sm:$0xff]  ;;  %v1981_v39 = vld [vmem:[%s5379_s22 + $0x2a8] sm:$0xff]  ;;  %v2012_v40 = vld [vmem:[%s5379_s22 + $0x3a0] sm:$0xff] }
 0x97c   :  { %v2013_v41 = vld [vmem:[%s5379_s22 + $0x3a8] sm:$0xff] }
 0x97e   :  { %3527 = vmatpush3.bf16.msra.mxu1 %v3526_v50  ;;  %3559 = vmatpush3.bf16.msra.mxu0 %v3558_v51  ;;  %v3580_v50 = vpack.c.bf16 %v1977_v48, %v1976_v47  ;;  %v2009_v51 = vld [vmem:[%s5379_s22 + $0x388] sm:$0xff] }
 0x97f   :  { %3529 = vmatprep.subr.bf16.mxu1 %v3528_v54  ;;  %3561 = vmatprep.subr.bf16.mxu0 %v3560_v55  ;;  %v3612_v52 = vpack.c.bf16 %v2009_v51, %v2008_v49  ;;  %v4654_v54 = vshrl.u32 %v1229_v53, 7  ;;  %v1965_v47 = vld [vmem:[%s5379_s22 + $0x228] sm:$0xff]  ;;  %v3620_v51 = vpack.c.bf16 %v2013_v41, %v2012_v40  ;;  %v2018_v40 = vld [vmem:[%s5379_s22 + $0x3d0] sm:$0xff]  ;;  %v2019_v41 = vld [vmem:[%s5379_s22 + $0x3d8] sm:$0xff] }
 0x980   :  { %v1997_v53 = vld [vmem:[%s5379_s22 + $0x328] sm:$0xff] }
 0x981   :  { %v1255_v55 = vsub.s32 6, %v4654_v54  ;;  %v1231_v58 = vsub.s32 0, %v4654_v54  ;;  %v1239_v62 = vsub.s32 2, %v4654_v54  ;;  %v1235_v60 = vsub.s32 1, %v4654_v54 }
 0x982   :  { %3531 = vmatpush3.bf16.msra.mxu1 %v3530_v61  ;;  %3563 = vmatpush3.bf16.msra.mxu0 %v3562_v63  ;;  %v1243_v61 = vsub.s32 3, %v4654_v54  ;;  %v1251_v18 = vsub.s32 5, %v4654_v54  ;;  %v1259_v19 = vsub.s32 7, %v4654_v54 }
 0x983   :  { %3533 = vmatprep.subr.bf16.mxu1 %v3532_v9  ;;  %3565 = vmatprep.subr.bf16.mxu0 %v3564_v3  ;;  %v4665_v57 = vrot.slane %v4660_v56, %v1255_v55  ;;  %v1232_v63 = vrot.slane %v4672_v59, %v1231_v58  ;;  %v1240_v0 = vrot.slane %v4672_v59, %v1239_v62 }
 0x984   :  { %v1236_v1 = vrot.slane %v4672_v59, %v1235_v60  ;;  %v1244_v9 = vrot.slane %v4672_v59, %v1243_v61  ;;  %v1252_v37 = vrot.slane %v4672_v59, %v1251_v18  ;;  %v1272_v14 = vrot.slane %v4660_v56, %v1239_v62  ;;  %v2016_v62 = vld [vmem:[%s5379_s22 + $0x3c0] sm:$0xff] }
 0x986   :  { %3535 = vmatpush3.bf16.msra.mxu1 %v3534_v11  ;;  %3567 = vmatpush3.bf16.msra.mxu0 %v3566_v12  ;;  %v1992_v12 = vld [vmem:[%s5379_s22 + $0x300] sm:$0xff] }
 0x987   :  { %3537 = vmatprep.subr.bf16.mxu1 %v3536_v16  ;;  %3569 = vmatprep.subr.bf16.mxu0 %v3568_v17  ;;  %v3614_v27 = vpack.c.bf16 %v1993_v13, %v1992_v12  ;;  %v1967_v12 = vld [vmem:[%s5379_s22 + $0x238] sm:$0xff]  ;;  %v1998_v13 = vld [vmem:[%s5379_s22 + $0x330] sm:$0xff] }
 0x98a   :  { %3539 = vmatpush3.bf16.msra.mxu1 %v3538_v25  ;;  %3571 = vmatpush3.bf16.msra.mxu0 %v3570_v26  ;;  %v3582_v26 = vpack.c.bf16 %v1961_v6, %v1960_v5 }
 0x98b   :  { %3541 = vmatprep.subr.bf16.mxu1 %v3540_v28  ;;  %3573 = vmatprep.subr.bf16.mxu0 %v3572_v29  ;;  %v1962_v28 = vld [vmem:[%s5379_s22 + $0x210] sm:$0xff]  ;;  %v1963_v29 = vld [vmem:[%s5379_s22 + $0x218] sm:$0xff] }
 0x98c   :  { %v3586_v44 = vpack.c.bf16 %v1963_v29, %v1962_v28  ;;  %v1968_v29 = vld [vmem:[%s5379_s22 + $0x240] sm:$0xff] }
 0x98e   :  { %3543 = vmatpush3.bf16.msra.mxu1 %v3542_v33  ;;  %3575 = vmatpush3.bf16.msra.mxu0 %v3574_v34  ;;  %v3616_v33 = vpack.c.bf16 %v2011_v23, %v2010_v21  ;;  %v1994_v34 = vld [vmem:[%s5379_s22 + $0x310] sm:$0xff]  ;;  %v1985_v21 = vld [vmem:[%s5379_s22 + $0x2c8] sm:$0xff] }
 0x98f   :  { %3545 = vmatprep.subr.bf16.mxu1 %v3544_v38  ;;  %3577 = vmatprep.subr.bf16.mxu0 %v3576_v42  ;;  %v1260_v38 = vrot.slane %v4672_v59, %v1259_v19  ;;  %v3618_v45 = vpack.c.bf16 %v1995_v35, %v1994_v34  ;;  %v2017_v23 = vld [vmem:[%s5379_s22 + $0x3c8] sm:$0xff]  ;;  %v3596_v28 = vpack.c.bf16 %v1985_v21, %v1984_v20  ;;  %v1991_v20 = vld [vmem:[%s5379_s22 + $0x2f8] sm:$0xff]  ;;  %v2022_v21 = vld [vmem:[%s5379_s22 + $0x3f0] sm:$0xff] }
 0x990   :  { %v3628_v35 = vpack.c.bf16 %v2017_v23, %v2016_v62  ;;  %v2023_v62 = vld [vmem:[%s5379_s22 + $0x3f8] sm:$0xff] }
 0x992   :  { %3547 = vmatpush3.bf16.msra.mxu1 %v3546_v43  ;;  %3579 = vmatpush3.bf16.msra.mxu0 %v3578_v46  ;;  %v1964_v46 = vld [vmem:[%s5379_s22 + $0x220] sm:$0xff] }
 0x993   :  { %3581 = vmatprep.subr.bf16.mxu1 %v3580_v50  ;;  %3613 = vmatprep.subr.bf16.mxu0 %v3612_v52  ;;  %v3588_v50 = vpack.c.bf16 %v1981_v39, %v1980_v36  ;;  %v1996_v52 = vld [vmem:[%s5379_s22 + $0x320] sm:$0xff]  ;;  %v3590_v5 = vpack.c.bf16 %v1965_v47, %v1964_v46  ;;  %v1987_v39 = vld [vmem:[%s5379_s22 + $0x2d8] sm:$0xff]  ;;  %v1970_v47 = vld [vmem:[%s5379_s22 + $0x250] sm:$0xff] }
 0x994   :  { %v2000_v36 = vld [vmem:[%s5379_s22 + $0x340] sm:$0xff] }
 0xa30   :  { %v1378_v3 = vpop.f32.mrb[26].mxu1  ;;  %v1449_v4 = vpop.f32.mrb[30].mxu0 }
 0xa31   :  { %v1379_v7 = vadd.f32 %v1378_v3, %v1232_v63  ;;  %v1450_v15 = vadd.f32 %v1449_v4, %v1240_v0  ;;  %v1380_v10 = vpop.f32.mrb[27].mxu1  ;;  %v1451_v11 = vpop.f32.mrb[31].mxu0  ;;  %v1982_v63 = vld [vmem:[%s5379_s22 + $0x2b0] sm:$0xff]  ;;  %v2015_v4 = vld [vmem:[%s5379_s22 + $0x3b8] sm:$0xff] }
 0xa32   :  { %v1381_v16 = vadd.f32 %v1380_v10, %v1236_v1  ;;  %v1452_v17 = vadd.f32 %v1451_v11, %v1244_v9  ;;  %v1983_v9 = vld [vmem:[%s5379_s22 + $0x2b8] sm:$0xff]  ;;  %v2014_v3 = vld [vmem:[%s5379_s22 + $0x3b0] sm:$0xff]  ;;  %v3622_v10 = vpack.c.bf16 %v1997_v53, %v1996_v52  ;;  %v3632_v52 = vpack.c.bf16 %v2019_v41, %v2018_v40 }
 0xa33   :  { %v1880_v30 = vmax.f32 %v1379_v7, 0.0  ;;  %v1882_v31 = vmax.f32 %v1450_v15, 0.0  ;;  %v1264_v15 = vrot.slane %v4660_v56, %v1231_v58  ;;  %v1966_v11 = vld [vmem:[%s5379_s22 + $0x230] sm:$0xff]  ;;  %v3592_v58 = vpack.c.bf16 %v1983_v9, %v1982_v63  ;;  %v2003_v53 = vld [vmem:[%s5379_s22 + $0x358] sm:$0xff]  ;;  %v1988_v63 = vld [vmem:[%s5379_s22 + $0x2e0] sm:$0xff] }
 0xa34   :  { %v1881_v24 = vmax.f32 %v1381_v16, 0.0  ;;  %v1883_v25 = vmax.f32 %v1452_v17, 0.0  ;;  %v3624_v16 = vpack.c.bf16 %v2015_v4, %v2014_v3  ;;  %v1999_v17 = vld [vmem:[%s5379_s22 + $0x338] sm:$0xff]  ;;  %v2021_v9 = vld [vmem:[%s5379_s22 + $0x3e8] sm:$0xff]  ;;  %v1276_v40 = vrot.slane %v4660_v56, %v1243_v61 }
 0xa35   :  { %v2025_v61 = vld [vmem:[%s5379_s22 + $0x408] sm:$0xff] }
 0xa36   :  { %2223 = vmatprep.mubr.f32.mxu1 %v1881_v24  ;;  %2293 = vmatprep.mubr.f32.mxu0 %v1883_v25 }
 0xa37   :  { %2224 = vmatmul.mubr.f32.vlgmr.msra.gmra.mrb[34].mxu1 %v1880_v30  ;;  %2294 = vmatmul.mubr.f32.vlgmr.msra.gmra.mrb[38].mxu0 %v1882_v31  ;;  %v1969_v30 = vld [vmem:[%s5379_s22 + $0x248] sm:$0xff] }
 0xa38   :  { %v4744_v42 = vpop.f32.mrb[28].mxu1  ;;  %v4746_v43 = vpop.f32.mrb[32].mxu0  ;;  %3583 = vmatpush3.bf16.msra.mxu1 %v3582_v26  ;;  %3615 = vmatpush3.bf16.msra.mxu0 %v3614_v27  ;;  %v3594_v26 = vpack.c.bf16 %v1967_v12, %v1966_v11  ;;  %v3626_v27 = vpack.c.bf16 %v1999_v17, %v1998_v13  ;;  %v2005_v17 = vld [vmem:[%s5379_s22 + $0x368] sm:$0xff] }
 0xa39   :  { %v1522_v48 = vpop.f32.mrb[29].mxu1  ;;  %v1593_v49 = vpop.f32.mrb[33].mxu0  ;;  %3585 = vmatprep.subr.bf16.mxu1 %v3584_v32  ;;  %3617 = vmatprep.subr.bf16.mxu0 %v3616_v33 }
 0xa3a   :  { %v1523_v0 = vadd.f32 %v1522_v48, %v1252_v37  ;;  %v1594_v1 = vadd.f32 %v1593_v49, %v1260_v38  ;;  %v2001_v37 = vld [vmem:[%s5379_s22 + $0x348] sm:$0xff]  ;;  %v1986_v38 = vld [vmem:[%s5379_s22 + $0x2d0] sm:$0xff]  ;;  %v1971_v48 = vld [vmem:[%s5379_s22 + $0x258] sm:$0xff] }
 0xa3b   :  { %v3630_v46 = vpack.c.bf16 %v2001_v37, %v2000_v36  ;;  %v2002_v49 = vld [vmem:[%s5379_s22 + $0x350] sm:$0xff]  ;;  %v2007_v36 = vld [vmem:[%s5379_s22 + $0x378] sm:$0xff]  ;;  %v2040_v37 = vld [vmem:[%s5379_s22 + $0x480] sm:$0xff] }
 0xa3c   :  { %v1885_v6 = vmax.f32 %v1523_v0, 0.0  ;;  %v1887_v7 = vmax.f32 %v1594_v1, 0.0  ;;  %3587 = vmatpush3.bf16.msra.mxu1 %v3586_v44  ;;  %3619 = vmatpush3.bf16.msra.mxu0 %v3618_v45  ;;  %v1247_v44 = vsub.s32 4, %v4654_v54  ;;  %v3598_v45 = vpack.c.bf16 %v1969_v30, %v1968_v29  ;;  %v1989_v0 = vld [vmem:[%s5379_s22 + $0x2e8] sm:$0xff]  ;;  %v2020_v1 = vld [vmem:[%s5379_s22 + $0x3e0] sm:$0xff] }
 0xa3d   :  { %3589 = vmatprep.subr.bf16.mxu1 %v3588_v50  ;;  %3621 = vmatprep.subr.bf16.mxu0 %v3620_v51  ;;  %v3600_v51 = vpack.c.bf16 %v1987_v39, %v1986_v38  ;;  %v1256_v29 = vrot.slane %v4672_v59, %v1255_v55  ;;  %v2041_v38 = vld [vmem:[%s5379_s22 + $0x488] sm:$0xff]  ;;  %v1268_v55 = vrot.slane %v4660_v56, %v1235_v60  ;;  %v2120_v54 = vld [vmem:[%s5379_s22 + $0x700] sm:$0xff] }
 0xa3e   :  { %2363 = vmatprep.mubr.f32.mxu1 %v1885_v6  ;;  %2433 = vmatprep.mubr.f32.mxu0 %v1887_v7  ;;  %v1280_v50 = vrot.slane %v4660_v56, %v1247_v44  ;;  %v3634_v6 = vpack.c.bf16 %v2003_v53, %v2002_v49  ;;  %v3604_v7 = vpack.c.bf16 %v1989_v0, %v1988_v63  ;;  %v2073_v39 = vld [vmem:[%s5379_s22 + $0x588] sm:$0xff]  ;;  %v2075_v53 = vld [vmem:[%s5379_s22 + $0x598] sm:$0xff] }
 0xa3f   :  { %v1248_v23 = vrot.slane %v4672_v59, %v1247_v44  ;;  %v2072_v59 = vld [vmem:[%s5379_s22 + $0x580] sm:$0xff]  ;;  %v1592_v60 = vadd.f32 %v4746_v43, %v1256_v29  ;;  %v2042_v43 = vld [vmem:[%s5379_s22 + $0x490] sm:$0xff]  ;;  %v2047_v29 = vld [vmem:[%s5379_s22 + $0x4b8] sm:$0xff] }
 0xa40   :  { %v1662_v24 = vpop.f32.mrb[30].mxu1  ;;  %v1733_v25 = vpop.f32.mrb[34].mxu0  ;;  %3591 = vmatpush3.bf16.msra.mxu1 %v3590_v5  ;;  %3623 = vmatpush3.bf16.msra.mxu0 %v3622_v10  ;;  %v3602_v5 = vpack.c.bf16 %v1971_v48, %v1970_v47  ;;  %v1973_v10 = vld [vmem:[%s5379_s22 + $0x268] sm:$0xff]  ;;  %v3676_v47 = vpack.c.bf16 %v2073_v39, %v2072_v59  ;;  %v2024_v48 = vld [vmem:[%s5379_s22 + $0x400] sm:$0xff]  ;;  %v2031_v59 = vld [vmem:[%s5379_s22 + $0x438] sm:$0xff] }
 0xa41   :  { %v4808_v31 = vadd.f32 %v1662_v24, %v1264_v15  ;;  %v4810_v32 = vadd.f32 %v1733_v25, %v1272_v14  ;;  %v4812_v33 = vpop.f32.mrb[31].mxu1  ;;  %v4814_v34 = vpop.f32.mrb[35].mxu0  ;;  %3593 = vmatprep.subr.bf16.mxu1 %v3592_v58  ;;  %3625 = vmatprep.subr.bf16.mxu0 %v3624_v16  ;;  %v1972_v15 = vld [vmem:[%s5379_s22 + $0x260] sm:$0xff]  ;;  %v3636_v58 = vpack.c.bf16 %v2021_v9, %v2020_v1  ;;  %v1886_v1 = vmax.f32 %v1592_v60, 0.0  ;;  %v2026_v9 = vld [vmem:[%s5379_s22 + $0x410] sm:$0xff]  ;;  %v2081_v60 = vld [vmem:[%s5379_s22 + $0x5c8] sm:$0xff] }
 0xa42   :  { %v2004_v16 = vld [vmem:[%s5379_s22 + $0x360] sm:$0xff]  ;;  %v3606_v24 = vpack.c.bf16 %v1973_v10, %v1972_v15  ;;  %v1665_v49 = vadd.f32 %v4812_v33, %v1268_v55  ;;  %v2074_v33 = vld [vmem:[%s5379_s22 + $0x590] sm:$0xff]  ;;  %v3646_v63 = vpack.c.bf16 %v2025_v61, %v2024_v48  ;;  %v2059_v15 = vld [vmem:[%s5379_s22 + $0x518] sm:$0xff] }
 0xa43   :  { %v3638_v25 = vpack.c.bf16 %v2005_v17, %v2004_v16  ;;  %v2044_v10 = vld [vmem:[%s5379_s22 + $0x4a0] sm:$0xff]  ;;  %v2030_v55 = vld [vmem:[%s5379_s22 + $0x430] sm:$0xff] }
 0xa44   :  { %3595 = vmatpush3.bf16.msra.mxu1 %v3594_v26  ;;  %3627 = vmatpush3.bf16.msra.mxu0 %v3626_v27  ;;  %v1974_v26 = vld [vmem:[%s5379_s22 + $0x270] sm:$0xff]  ;;  %v1975_v27 = vld [vmem:[%s5379_s22 + $0x278] sm:$0xff]  ;;  %v2076_v17 = vld [vmem:[%s5379_s22 + $0x5a0] sm:$0xff] }
 0xa45   :  { %3597 = vmatprep.subr.bf16.mxu1 %v3596_v28  ;;  %3629 = vmatprep.subr.bf16.mxu0 %v3628_v35  ;;  %v2006_v28 = vld [vmem:[%s5379_s22 + $0x370] sm:$0xff]  ;;  %v3640_v35 = vpack.c.bf16 %v2023_v62, %v2022_v21  ;;  %v3610_v41 = vpack.c.bf16 %v1975_v27, %v1974_v26  ;;  %v2061_v27 = vld [vmem:[%s5379_s22 + $0x528] sm:$0xff] }
 0xa46   :  { %v3642_v44 = vpack.c.bf16 %v2007_v36, %v2006_v28  ;;  %v2046_v28 = vld [vmem:[%s5379_s22 + $0x4b0] sm:$0xff] }
 0xa47   :  { %v2062_v39 = vld [vmem:[%s5379_s22 + $0x530] sm:$0xff] }
 0xa48   :  { %v1804_v3 = vpop.f32.mrb[32].mxu1  ;;  %v1875_v4 = vpop.f32.mrb[36].mxu0  ;;  %3599 = vmatpush3.bf16.msra.mxu1 %v3598_v45  ;;  %3631 = vmatpush3.bf16.msra.mxu0 %v3630_v46  ;;  %v3644_v45 = vpack.c.bf16 %v2041_v38, %v2040_v37  ;;  %v1521_v46 = vadd.f32 %v4744_v42, %v1248_v23  ;;  %v2057_v42 = vld [vmem:[%s5379_s22 + $0x508] sm:$0xff]  ;;  %v2028_v23 = vld [vmem:[%s5379_s22 + $0x420] sm:$0xff]  ;;  %v3656_v38 = vpack.c.bf16 %v2047_v29, %v2046_v28  ;;  %v2087_v28 = vld [vmem:[%s5379_s22 + $0x5f8] sm:$0xff] }
 0xa49   :  { %v4866_v11 = vadd.f32 %v1804_v3, %v1280_v50  ;;  %v4869_v12 = vadd.f32 %v1875_v4, %v4665_v57  ;;  %v4871_v13 = vpop.f32.mrb[33].mxu1  ;;  %v4873_v14 = vpop.f32.mrb[37].mxu0  ;;  %3601 = vmatprep.subr.bf16.mxu1 %v3600_v51  ;;  %3633 = vmatprep.subr.bf16.mxu0 %v3632_v52  ;;  %v1990_v57 = vld [vmem:[%s5379_s22 + $0x2f0] sm:$0xff]  ;;  %v2056_v50 = vld [vmem:[%s5379_s22 + $0x500] sm:$0xff]  ;;  %v1736_v51 = vadd.f32 %v4814_v34, %v1276_v40  ;;  %v2043_v52 = vld [vmem:[%s5379_s22 + $0x498] sm:$0xff] }
 0xa4a   :  { %v3608_v30 = vpack.c.bf16 %v1991_v20, %v1990_v57  ;;  %v1884_v0 = vmax.f32 %v1521_v46, 0.0  ;;  %v3678_v34 = vpack.c.bf16 %v2057_v42, %v2056_v50  ;;  %v2027_v3 = vld [vmem:[%s5379_s22 + $0x418] sm:$0xff]  ;;  %v2058_v4 = vld [vmem:[%s5379_s22 + $0x510] sm:$0xff]  ;;  %v2077_v57 = vld [vmem:[%s5379_s22 + $0x5a8] sm:$0xff] }
 0xa4b   :  { %v1891_v16 = vmax.f32 %v1736_v51, 0.0  ;;  %v3650_v20 = vpack.c.bf16 %v2027_v3, %v2026_v9  ;;  %v3682_v21 = vpack.c.bf16 %v2059_v15, %v2058_v4  ;;  %v3684_v26 = vpack.c.bf16 %v2077_v57, %v2076_v17  ;;  %v2080_v46 = vld [vmem:[%s5379_s22 + $0x5c0] sm:$0xff]  ;;  %v2033_v50 = vld [vmem:[%s5379_s22 + $0x448] sm:$0xff]  ;;  %v2034_v9 = vld [vmem:[%s5379_s22 + $0x450] sm:$0xff] }
 0xa4c   :  { %3603 = vmatpush3.bf16.msra.mxu1 %v3602_v5  ;;  %3635 = vmatpush3.bf16.msra.mxu0 %v3634_v6  ;;  %v1889_v5 = vmax.f32 %v1665_v49, 0.0  ;;  %v3648_v6 = vpack.c.bf16 %v2043_v52, %v2042_v43  ;;  %v2032_v49 = vld [vmem:[%s5379_s22 + $0x440] sm:$0xff]  ;;  %v3692_v43 = vpack.c.bf16 %v2081_v60, %v2080_v46  ;;  %v2065_v51 = vld [vmem:[%s5379_s22 + $0x548] sm:$0xff]  ;;  %v2050_v52 = vld [vmem:[%s5379_s22 + $0x4d0] sm:$0xff]  ;;  %v1292_v46 = vrot.slane %v4660_v56, %v1259_v19 }
 0xa4d   :  { %3605 = vmatprep.subr.bf16.mxu1 %v3604_v7  ;;  %3637 = vmatprep.subr.bf16.mxu0 %v3636_v58  ;;  %v3680_v7 = vpack.c.bf16 %v2075_v53, %v2074_v33  ;;  %v2045_v58 = vld [vmem:[%s5379_s22 + $0x4a8] sm:$0xff]  ;;  %v2064_v42 = vld [vmem:[%s5379_s22 + $0x540] sm:$0xff]  ;;  %v2051_v33 = vld [vmem:[%s5379_s22 + $0x4d8] sm:$0xff] }
 0xa4e   :  { %v3652_v62 = vpack.c.bf16 %v2045_v58, %v2044_v10  ;;  %v2082_v53 = vld [vmem:[%s5379_s22 + $0x5d0] sm:$0xff]  ;;  %v2035_v3 = vld [vmem:[%s5379_s22 + $0x458] sm:$0xff]  ;;  %v2053_v15 = vld [vmem:[%s5379_s22 + $0x4e8] sm:$0xff] }
 0xa4f   :  { %v2066_v4 = vld [vmem:[%s5379_s22 + $0x550] sm:$0xff]  ;;  %v2084_v10 = vld [vmem:[%s5379_s22 + $0x5e0] sm:$0xff]  ;;  %v2085_v58 = vld [vmem:[%s5379_s22 + $0x5e8] sm:$0xff] }
 0xa50   :  { %3607 = vmatpush3.bf16.msra.mxu1 %v3606_v24  ;;  %3639 = vmatpush3.bf16.msra.mxu0 %v3638_v25  ;;  %v2029_v24 = vld [vmem:[%s5379_s22 + $0x428] sm:$0xff]  ;;  %v2060_v25 = vld [vmem:[%s5379_s22 + $0x520] sm:$0xff] }
 0xa51   :  { %3609 = vmatprep.subr.bf16.mxu1 %v3608_v30  ;;  %3641 = vmatprep.subr.bf16.mxu0 %v3640_v35  ;;  %v2078_v30 = vld [vmem:[%s5379_s22 + $0x5b0] sm:$0xff]  ;;  %v2079_v35 = vld [vmem:[%s5379_s22 + $0x5b8] sm:$0xff]  ;;  %v3654_v36 = vpack.c.bf16 %v2029_v24, %v2028_v23  ;;  %v3686_v37 = vpack.c.bf16 %v2061_v27, %v2060_v25  ;;  %v3700_v23 = vpack.c.bf16 %v2085_v58, %v2084_v10  ;;  %v2069_v24 = vld [vmem:[%s5379_s22 + $0x568] sm:$0xff] }
 0xa52   :  { %v3688_v40 = vpack.c.bf16 %v2079_v35, %v2078_v30  ;;  %v2054_v25 = vld [vmem:[%s5379_s22 + $0x4f0] sm:$0xff] }
 0xa53   :  { %v2086_v27 = vld [vmem:[%s5379_s22 + $0x5f0] sm:$0xff] }
 0xa54   :  { %3611 = vmatpush3.bf16.msra.mxu1 %v3610_v41  ;;  %3643 = vmatpush3.bf16.msra.mxu0 %v3642_v44  ;;  %v2063_v41 = vld [vmem:[%s5379_s22 + $0x538] sm:$0xff]  ;;  %v2048_v44 = vld [vmem:[%s5379_s22 + $0x4c0] sm:$0xff] }
 0xa55   :  { %3645 = vmatprep.subr.bf16.mxu1 %v3644_v45  ;;  %3677 = vmatprep.subr.bf16.mxu0 %v3676_v47  ;;  %v2049_v45 = vld [vmem:[%s5379_s22 + $0x4c8] sm:$0xff]  ;;  %v3658_v47 = vpack.c.bf16 %v2031_v59, %v2030_v55  ;;  %v3690_v48 = vpack.c.bf16 %v2063_v41, %v2062_v39  ;;  %v3704_v55 = vpack.c.bf16 %v2087_v28, %v2086_v27  ;;  %v2071_v59 = vld [vmem:[%s5379_s22 + $0x578] sm:$0xff]  ;;  %v2104_v39 = vld [vmem:[%s5379_s22 + $0x680] sm:$0xff] }
 0xa56   :  { %v3660_v61 = vpack.c.bf16 %v2049_v45, %v2048_v44  ;;  %v1284_v41 = vrot.slane %v4660_v56, %v1251_v18  ;;  %v2136_v44 = vld [vmem:[%s5379_s22 + $0x780] sm:$0xff]  ;;  %v2137_v45 = vld [vmem:[%s5379_s22 + $0x788] sm:$0xff] }
 0xa57   :  { %2364 = vmatmul.mubr.f32.vlgmr.msra.gmra.mrb[36].mxu1 %v1884_v0  ;;  %2434 = vmatmul.mubr.f32.vlgmr.msra.gmra.mrb[40].mxu0 %v1886_v1  ;;  %v3662_v0 = vpack.c.bf16 %v2033_v50, %v2032_v49  ;;  %v3694_v1 = vpack.c.bf16 %v2065_v51, %v2064_v42  ;;  %v2088_v18 = vld [vmem:[%s5379_s22 + $0x600] sm:$0xff]  ;;  %v3740_v49 = vpack.c.bf16 %v2137_v45, %v2136_v44  ;;  %v2121_v56 = vld [vmem:[%s5379_s22 + $0x708] sm:$0xff]  ;;  %v2106_v50 = vld [vmem:[%s5379_s22 + $0x690] sm:$0xff] }
 0xa58   :  { %3647 = vmatpush3.bf16.msra.mxu1 %v3646_v63  ;;  %2503 = vmatprep.mubr.f32.mxu1 %v1889_v5  ;;  %v2083_v63 = vld [vmem:[%s5379_s22 + $0x5d8] sm:$0xff]  ;;  %v1807_v19 = vadd.f32 %v4871_v13, %v1284_v41  ;;  %v2096_v45 = vld [vmem:[%s5379_s22 + $0x640] sm:$0xff] }
 0xa59   :  { %3679 = vmatpush3.bf16.msra.mxu0 %v3678_v34  ;;  %2573 = vmatprep.mubr.f32.mxu0 %v1891_v16  ;;  %v3664_v34 = vpack.c.bf16 %v2051_v33, %v2050_v52  ;;  %v3696_v5 = vpack.c.bf16 %v2083_v63, %v2082_v53  ;;  %v3666_v16 = vpack.c.bf16 %v2035_v3, %v2034_v9  ;;  %v2107_v42 = vld [vmem:[%s5379_s22 + $0x698] sm:$0xff]  ;;  %v2138_v52 = vld [vmem:[%s5379_s22 + $0x790] sm:$0xff]  ;;  %v1888_v33 = vmax.f32 %v4808_v31, 0.0  ;;  %v2108_v9 = vld [vmem:[%s5379_s22 + $0x6a0] sm:$0xff] }
 0xa5a   :  { %3649 = vmatprep.subr.bf16.mxu1 %v3648_v6  ;;  %3681 = vmatprep.subr.bf16.mxu0 %v3680_v7  ;;  %v2067_v6 = vld [vmem:[%s5379_s22 + $0x558] sm:$0xff]  ;;  %v2052_v7 = vld [vmem:[%s5379_s22 + $0x4e0] sm:$0xff]  ;;  %v3742_v53 = vpack.c.bf16 %v2121_v56, %v2120_v54  ;;  %v2090_v63 = vld [vmem:[%s5379_s22 + $0x610] sm:$0xff] }
 0xa5b   :  { %v3698_v17 = vpack.c.bf16 %v2067_v6, %v2066_v4  ;;  %v3668_v57 = vpack.c.bf16 %v2053_v15, %v2052_v7  ;;  %v2139_v13 = vld [vmem:[%s5379_s22 + $0x798] sm:$0xff]  ;;  %v2109_v3 = vld [vmem:[%s5379_s22 + $0x6a8] sm:$0xff]  ;;  %v1893_v4 = vmax.f32 %v1807_v19, 0.0 }
 0xa5c   :  { %3651 = vmatpush3.bf16.msra.mxu1 %v3650_v20  ;;  %v2036_v20 = vld [vmem:[%s5379_s22 + $0x460] sm:$0xff]  ;;  %v2123_v31 = vld [vmem:[%s5379_s22 + $0x718] sm:$0xff]  ;;  %v2141_v6 = vld [vmem:[%s5379_s22 + $0x7a8] sm:$0xff]  ;;  %v3716_v58 = vpack.c.bf16 %v2109_v3, %v2108_v9 }
 0xa5d   :  { %3683 = vmatpush3.bf16.msra.mxu0 %v3682_v21  ;;  %3653 = vmatprep.subr.bf16.mxu1 %v3652_v62  ;;  %v2037_v21 = vld [vmem:[%s5379_s22 + $0x468] sm:$0xff]  ;;  %v2068_v62 = vld [vmem:[%s5379_s22 + $0x560] sm:$0xff]  ;;  %v2147_v54 = vld [vmem:[%s5379_s22 + $0x7d8] sm:$0xff] }
 0xa5e   :  { %3685 = vmatprep.subr.bf16.mxu0 %v3684_v26  ;;  %v2055_v26 = vld [vmem:[%s5379_s22 + $0x4f8] sm:$0xff]  ;;  %v3670_v29 = vpack.c.bf16 %v2037_v21, %v2036_v20  ;;  %v3702_v30 = vpack.c.bf16 %v2069_v24, %v2068_v62  ;;  %v2125_v21 = vld [vmem:[%s5379_s22 + $0x728] sm:$0xff]  ;;  %v2110_v62 = vld [vmem:[%s5379_s22 + $0x6b0] sm:$0xff] }
 0xa5f   :  { %v3672_v35 = vpack.c.bf16 %v2055_v26, %v2054_v25  ;;  %v2142_v24 = vld [vmem:[%s5379_s22 + $0x7b0] sm:$0xff]  ;;  %v2143_v25 = vld [vmem:[%s5379_s22 + $0x7b8] sm:$0xff]  ;;  %v2101_v9 = vld [vmem:[%s5379_s22 + $0x668] sm:$0xff] }
 0xa60   :  { %3655 = vmatpush3.bf16.msra.mxu1 %v3654_v36  ;;  %v2038_v36 = vld [vmem:[%s5379_s22 + $0x470] sm:$0xff]  ;;  %v2132_v3 = vld [vmem:[%s5379_s22 + $0x760] sm:$0xff] }
 0xa61   :  { %3687 = vmatpush3.bf16.msra.mxu0 %v3686_v37  ;;  %3657 = vmatprep.subr.bf16.mxu1 %v3656_v38  ;;  %v2039_v37 = vld [vmem:[%s5379_s22 + $0x478] sm:$0xff]  ;;  %v2070_v38 = vld [vmem:[%s5379_s22 + $0x570] sm:$0xff] }
 0xa62   :  { %3689 = vmatprep.subr.bf16.mxu0 %v3688_v40  ;;  %v2105_v40 = vld [vmem:[%s5379_s22 + $0x688] sm:$0xff]  ;;  %v3674_v60 = vpack.c.bf16 %v2039_v37, %v2038_v36  ;;  %v3752_v36 = vpack.c.bf16 %v2143_v25, %v2142_v24  ;;  %v2127_v37 = vld [vmem:[%s5379_s22 + $0x738] sm:$0xff]  ;;  %v1892_v25 = vmax.f32 %v4866_v11, 0.0 }
 0xa64   :  { %3659 = vmatpush3.bf16.msra.mxu1 %v3658_v47  ;;  %v3706_v47 = vpack.c.bf16 %v2071_v59, %v2070_v38  ;;  %v2112_v38 = vld [vmem:[%s5379_s22 + $0x6c0] sm:$0xff] }
 0xa65   :  { %3691 = vmatpush3.bf16.msra.mxu0 %v3690_v48  ;;  %3661 = vmatprep.subr.bf16.mxu1 %v3660_v61  ;;  %v3708_v48 = vpack.c.bf16 %v2105_v40, %v2104_v39  ;;  %v2089_v61 = vld [vmem:[%s5379_s22 + $0x608] sm:$0xff]  ;;  %v2144_v59 = vld [vmem:[%s5379_s22 + $0x7c0] sm:$0xff] }
 0xa66   :  { %3693 = vmatprep.subr.bf16.mxu0 %v3692_v43  ;;  %v1878_v43 = vadd.f32 %v4873_v14, %v1292_v46  ;;  %v3710_v51 = vpack.c.bf16 %v2089_v61, %v2088_v18  ;;  %v2091_v14 = vld [vmem:[%s5379_s22 + $0x618] sm:$0xff]  ;;  %v2145_v39 = vld [vmem:[%s5379_s22 + $0x7c8] sm:$0xff]  ;;  %v2114_v18 = vld [vmem:[%s5379_s22 + $0x6d0] sm:$0xff] }
 0xa67   :  { %v3714_v15 = vpack.c.bf16 %v2091_v14, %v2090_v63  ;;  %v2097_v46 = vld [vmem:[%s5379_s22 + $0x648] sm:$0xff]  ;;  %v2115_v61 = vld [vmem:[%s5379_s22 + $0x6d8] sm:$0xff]  ;;  %v2148_v63 = vld [vmem:[%s5379_s22 + $0x7e0] sm:$0xff] }
 0xa68   :  { %3663 = vmatpush3.bf16.msra.mxu1 %v3662_v0  ;;  %v2122_v0 = vld [vmem:[%s5379_s22 + $0x710] sm:$0xff]  ;;  %v1895_v7 = vmax.f32 %v1878_v43, 0.0  ;;  %v3726_v56 = vpack.c.bf16 %v2097_v46, %v2096_v45  ;;  %v2099_v43 = vld [vmem:[%s5379_s22 + $0x658] sm:$0xff]  ;;  %v2149_v14 = vld [vmem:[%s5379_s22 + $0x7e8] sm:$0xff] }
 0xa69   :  { %3695 = vmatpush3.bf16.msra.mxu0 %v3694_v1  ;;  %3665 = vmatprep.subr.bf16.mxu1 %v3664_v34  ;;  %v1890_v1 = vmax.f32 %v4810_v32, 0.0  ;;  %v3712_v34 = vpack.c.bf16 %v2107_v42, %v2106_v50  ;;  %v2140_v32 = vld [vmem:[%s5379_s22 + $0x7a0] sm:$0xff]  ;;  %v3746_v10 = vpack.c.bf16 %v2123_v31, %v2122_v0  ;;  %v3728_v50 = vpack.c.bf16 %v2115_v61, %v2114_v18  ;;  %v2098_v42 = vld [vmem:[%s5379_s22 + $0x650] sm:$0xff] }
 0xa6a   :  { %3697 = vmatprep.subr.bf16.mxu0 %v3696_v5  ;;  %v3744_v5 = vpack.c.bf16 %v2139_v13, %v2138_v52  ;;  %v3748_v20 = vpack.c.bf16 %v2141_v6, %v2140_v32  ;;  %v2131_v13 = vld [vmem:[%s5379_s22 + $0x758] sm:$0xff]  ;;  %v3730_v0 = vpack.c.bf16 %v2099_v43, %v2098_v42  ;;  %v2100_v31 = vld [vmem:[%s5379_s22 + $0x660] sm:$0xff]  ;;  %v2118_v32 = vld [vmem:[%s5379_s22 + $0x6f0] sm:$0xff] }
 0xa6b   :  { %v2119_v6 = vld [vmem:[%s5379_s22 + $0x6f8] sm:$0xff] }
 0xa6c   :  { %3667 = vmatpush3.bf16.msra.mxu1 %v3666_v16  ;;  %v2092_v16 = vld [vmem:[%s5379_s22 + $0x620] sm:$0xff] }
 0xa6d   :  { %3699 = vmatpush3.bf16.msra.mxu0 %v3698_v17  ;;  %3669 = vmatprep.subr.bf16.mxu1 %v3668_v57  ;;  %v2093_v17 = vld [vmem:[%s5379_s22 + $0x628] sm:$0xff]  ;;  %v2124_v57 = vld [vmem:[%s5379_s22 + $0x720] sm:$0xff] }
 0xa6e   :  { %3701 = vmatprep.subr.bf16.mxu0 %v3700_v23  ;;  %v2111_v23 = vld [vmem:[%s5379_s22 + $0x6b8] sm:$0xff]  ;;  %v3718_v26 = vpack.c.bf16 %v2093_v17, %v2092_v16  ;;  %v3750_v27 = vpack.c.bf16 %v2125_v21, %v2124_v57  ;;  %v3736_v16 = vpack.c.bf16 %v2119_v6, %v2118_v32  ;;  %v2102_v17 = vld [vmem:[%s5379_s22 + $0x670] sm:$0xff] }
 0xa6f   :  { %v3720_v28 = vpack.c.bf16 %v2111_v23, %v2110_v62  ;;  %v2103_v57 = vld [vmem:[%s5379_s22 + $0x678] sm:$0xff]  ;;  %v2134_v21 = vld [vmem:[%s5379_s22 + $0x770] sm:$0xff] }
 0xa70   :  { %3671 = vmatpush3.bf16.msra.mxu1 %v3670_v29  ;;  %v2094_v29 = vld [vmem:[%s5379_s22 + $0x630] sm:$0xff]  ;;  %v2135_v62 = vld [vmem:[%s5379_s22 + $0x778] sm:$0xff]  ;;  %v3738_v23 = vpack.c.bf16 %v2103_v57, %v2102_v17  ;;  %v2903_v17 = vld [vmem:[%s5384_s27] ss:$0 sm:$0xff] }
 0xa71   :  { %3703 = vmatpush3.bf16.msra.mxu0 %v3702_v30  ;;  %3673 = vmatprep.subr.bf16.mxu1 %v3672_v35  ;;  %v2095_v30 = vld [vmem:[%s5379_s22 + $0x638] sm:$0xff]  ;;  %v2126_v35 = vld [vmem:[%s5379_s22 + $0x730] sm:$0xff]  ;;  %v3770_v24 = vpack.c.bf16 %v2135_v62, %v2134_v21 }
 0xa72   :  { %3705 = vmatprep.subr.bf16.mxu0 %v3704_v55  ;;  %v2113_v55 = vld [vmem:[%s5379_s22 + $0x6c8] sm:$0xff]  ;;  %v3722_v40 = vpack.c.bf16 %v2095_v30, %v2094_v29  ;;  %v3754_v41 = vpack.c.bf16 %v2127_v37, %v2126_v35  ;;  %v2900_v29 = vld [vmem:[%s5420_s5] ss:$0 sm:$0xff] }
 0xa73   :  { %v3724_v44 = vpack.c.bf16 %v2113_v55, %v2112_v38 }
 0xa74   :  { %3675 = vmatpush3.bf16.msra.mxu1 %v3674_v60  ;;  %v2128_v60 = vld [vmem:[%s5379_s22 + $0x740] sm:$0xff] }
 0xa75   :  { %3707 = vmatpush3.bf16.msra.mxu0 %v3706_v47  ;;  %3709 = vmatprep.subr.bf16.mxu1 %v3708_v48  ;;  %v3756_v47 = vpack.c.bf16 %v2145_v39, %v2144_v59  ;;  %v2129_v48 = vld [vmem:[%s5379_s22 + $0x748] sm:$0xff] }
 0xa76   :  { %3741 = vmatprep.subr.bf16.mxu0 %v3740_v49  ;;  %v2146_v49 = vld [vmem:[%s5379_s22 + $0x7d0] sm:$0xff]  ;;  %v3758_v19 = vpack.c.bf16 %v2129_v48, %v2128_v60 }
 0xa77   :  { %2504 = vmatmul.mubr.f32.vlgmr.msra.gmra.mrb[38].mxu1 %v1888_v33  ;;  %v3760_v52 = vpack.c.bf16 %v2147_v54, %v2146_v49  ;;  %v2116_v33 = vld [vmem:[%s5379_s22 + $0x6e0] sm:$0xff] }
 0xa78   :  { %2574 = vmatmul.mubr.f32.vlgmr.msra.gmra.mrb[42].mxu0 %v1890_v1  ;;  %3711 = vmatpush3.bf16.msra.mxu1 %v3710_v51  ;;  %v2130_v51 = vld [vmem:[%s5379_s22 + $0x750] sm:$0xff] }
 0xa79   :  { %2643 = vmatprep.mubr.f32.mxu1 %v1893_v4  ;;  %3743 = vmatpush3.bf16.msra.mxu0 %v3742_v53  ;;  %v2117_v53 = vld [vmem:[%s5379_s22 + $0x6e8] sm:$0xff]  ;;  %v3762_v1 = vpack.c.bf16 %v2131_v13, %v2130_v51  ;;  %v3764_v4 = vpack.c.bf16 %v2149_v14, %v2148_v63 }
 0xa7a   :  { %2713 = vmatprep.mubr.f32.mxu0 %v1895_v7  ;;  %3713 = vmatprep.subr.bf16.mxu1 %v3712_v34  ;;  %v3732_v34 = vpack.c.bf16 %v2117_v53, %v2116_v33  ;;  %v2150_v7 = vld [vmem:[%s5379_s22 + $0x7f0] sm:$0xff] }
 0xa7b   :  { %3745 = vmatprep.subr.bf16.mxu0 %v3744_v5  ;;  %v2133_v5 = vld [vmem:[%s5379_s22 + $0x768] sm:$0xff] }
 0xa7c   :  { %3715 = vmatpush3.bf16.msra.mxu1 %v3714_v15  ;;  %v2151_v15 = vld [vmem:[%s5379_s22 + $0x7f8] sm:$0xff] }
 0xa7d   :  { %3747 = vmatpush3.bf16.msra.mxu0 %v3746_v10  ;;  %3717 = vmatprep.subr.bf16.mxu1 %v3716_v58  ;;  %v3734_v10 = vpack.c.bf16 %v2101_v9, %v2100_v31  ;;  %v3766_v58 = vpack.c.bf16 %v2133_v5, %v2132_v3  ;;  %v2751_v31 = vld [vmem:[%s5383_s26 + $0x8] sm:$0xff]  ;;  %v2753_v3 = vld [vmem:[%s5383_s26 + $0x18] sm:$0xff] }
 0xa7e   :  { %3749 = vmatprep.subr.bf16.mxu0 %v3748_v20  ;;  %v3768_v20 = vpack.c.bf16 %v2151_v15, %v2150_v7  ;;  %v2901_v15 = vld [vmem:[%s5381_s24] ss:$0 sm:$0xff]  ;;  %s3802_s24 = scalar_lea.vmem %s2843_s29, 32 }
 0xa7f   :  { %p3803_p0 = scmp.ne.s32.totalorder %s2843_s29, %s3802_s24  ;;  %p3808_p2 = scmp.lt.s32.totalorder %s3802_s24, %s3802_s24 }
 0xa80   :  { %3719 = vmatpush3.bf16.msra.mxu1 %v3718_v26  ;;  %v1894_v26 = vmax.f32 %v4869_v12, 0.0 }
 0xa81   :  { %3751 = vmatpush3.bf16.msra.mxu0 %v3750_v27  ;;  %3721 = vmatprep.subr.bf16.mxu1 %v3720_v28  ;;  %p3809_p3 = por %p3808_p2, %p3807_p1 }
 0xa82   :  { %3753 = vmatprep.subr.bf16.mxu0 %v3752_v36 }
 0xa83   :  { %p3810_p4 = pnand %p3809_p3, %p3803_p0 }
 0xa84   :  { %3723 = vmatpush3.bf16.msra.mxu1 %v3722_v40 }
 0xa85   :  { %3755 = vmatpush3.bf16.msra.mxu0 %v3754_v41  ;;  %3725 = vmatprep.subr.bf16.mxu1 %v3724_v44 }
 0xa86   :  { %3757 = vmatprep.subr.bf16.mxu0 %v3756_v47 }
 0xa88   :  { %3727 = vmatpush3.bf16.msra.mxu1 %v3726_v56 }
 0xa89   :  { %3759 = vmatpush3.bf16.msra.mxu0 %v3758_v19  ;;  %3729 = vmatprep.subr.bf16.mxu1 %v3728_v50 }
 0xa8a   :  { %3761 = vmatprep.subr.bf16.mxu0 %v3760_v52 }
 0xa8c   :  { %3731 = vmatpush3.bf16.msra.mxu1 %v3730_v0 }
 0xa8d   :  { %3763 = vmatpush3.bf16.msra.mxu0 %v3762_v1  ;;  %3733 = vmatprep.subr.bf16.mxu1 %v3732_v34  ;;  %v2750_v34 = vld [vmem:[%s5383_s26] sm:$0xff] }
 0xa8e   :  { %3765 = vmatprep.subr.bf16.mxu0 %v3764_v4  ;;  %v3773_v9 = vpack.c.bf16 %v2751_v31, %v2750_v34 }
 0xa90   :  { %3735 = vmatpush3.bf16.msra.mxu1 %v3734_v10  ;;  %v2902_v10 = vld [vmem:[%s5382_s25] ss:$0 sm:$0xff] }
 0xa91   :  { %3767 = vmatpush3.bf16.msra.mxu0 %v3766_v58  ;;  %3737 = vmatprep.subr.bf16.mxu1 %v3736_v16 }
 0xa92   :  { %3769 = vmatprep.subr.bf16.mxu0 %v3768_v20 }
 0xa94   :  { %3739 = vmatpush3.bf16.msra.mxu1 %v3738_v23 }
 0xa95   :  { %3771 = vmatpush3.bf16.msra.mxu0 %v3770_v24  ;;  %3772 = vmatprep.subr.bf16.mxu1 %v3828_v8 }
 0xa97   :  { %2644 = vmatmul.mubr.f32.vlgmr.msra.gmra.mrb[40].mxu1 %v1892_v25 }
 0xa98   :  { %2714 = vmatmul.mubr.f32.vlgmr.msra.gmra.mrb[44].mxu0 %v1894_v26  ;;  %3406 = vmatprep.mubr.msk.f32.mxu1 %vm3827_vm1, %v3826_v2 }
 0xa99   :  { %3774 = vmatpush3.bf16.msra.mxu1 %v3773_v9 }
 0xa9a   :  { %3775 = vmatprep.subr.bf16.mxu1 %v3828_v8 }
 0xb0a   :  { %v2997_v27 = vpop.f32.mrb[34].mxu1  ;;  %v3032_v28 = vpop.f32.mrb[38].mxu0 }
 0xb0b   :  { %v2998_v30 = vpop.f32.mrb[35].mxu1  ;;  %v3033_v35 = vpop.f32.mrb[39].mxu0 }
 0xb0c   :  { %v2999_v36 = vadd.f32 %v2998_v30, %v2997_v27  ;;  %v3034_v11 = vadd.f32 %v3033_v35, %v3032_v28 }
 0xb0e   :  { %v2226_v37 = vadd.f32 %v2999_v36, %v2900_v29 }
 0xb10   :  { %v2296_v38 = vadd.f32 %v3034_v11, %v2226_v37 }
 0xb2a   :  { %v3067_v55 = vpop.f32.mrb[36].mxu1  ;;  %v3102_v59 = vpop.f32.mrb[40].mxu0 }
 0xb2b   :  { %v3068_v12 = vpop.f32.mrb[37].mxu1  ;;  %v3103_v39 = vpop.f32.mrb[41].mxu0 }
 0xb2c   :  { %v3069_v40 = vadd.f32 %v3068_v12, %v3067_v55  ;;  %v3104_v41 = vadd.f32 %v3103_v39, %v3102_v59 }
 0xb2e   :  { %v2366_v44 = vadd.f32 %v3069_v40, %v2296_v38 }
 0xb30   :  { %v2436_v2 = vadd.f32 %v3104_v41, %v2366_v44 }
 0xb4a   :  { %v3137_v45 = vpop.f32.mrb[38].mxu1 }
 0xb4b   :  { %v3172_v46 = vpop.f32.mrb[42].mxu0  ;;  %v3138_v60 = vpop.f32.mrb[39].mxu1 }
 0xb4c   :  { %v3139_v47 = vadd.f32 %v3138_v60, %v3137_v45  ;;  %v3173_v48 = vpop.f32.mrb[43].mxu0 }
 0xb4d   :  { %v3174_v18 = vadd.f32 %v3173_v48, %v3172_v46 }
 0xb4e   :  { %v2506_v61 = vadd.f32 %v3139_v47, %v2436_v2 }
 0xb50   :  { %v2576_v49 = vadd.f32 %v3174_v18, %v2506_v61 }
 0xb6a   :  { %v3207_v54 = vpop.f32.mrb[40].mxu1 }
 0xb6b   :  { %v3242_v56 = vpop.f32.mrb[44].mxu0  ;;  %v3208_v19 = vpop.f32.mrb[41].mxu1 }
 0xb6c   :  { %v3209_v50 = vadd.f32 %v3208_v19, %v3207_v54  ;;  %v3243_v42 = vpop.f32.mrb[45].mxu0 }
 0xb6d   :  { %v3244_v43 = vadd.f32 %v3243_v42, %v3242_v56 }
 0xb6e   :  { %v2646_v51 = vadd.f32 %v3209_v50, %v2576_v49 }
 0xb70   :  { %v2716_v52 = vadd.f32 %v3244_v43, %v2646_v51 }
 0xb72   :  { %v2719_v13 = vadd.f32 %v2716_v52, %v4333_v22  ;;  %v2752_v22 = vld [vmem:[%s5383_s26 + $0x10] sm:$0xff] }
 0xb73   :  { %v3776_v4 = vpack.c.bf16 %v2753_v3, %v2752_v22 }
 0xb74   :  { %v2721_v33 = vsel %vm2720_vm9, %v2719_v13, 0.0 }
 0xb75   :  { %2722 = vadd.xlane.f32.xlu0 %v2721_v33  ;;  %3777 = vmatpush3.bf16.msra.mxu1 %v3776_v4 }
 0xc02   :  { %v2723_v53 = vpop.xlane.xlu0 %2722 }
 0xc03   :  { %v2724_v63 = vmul.f32 0.03125, %v2723_v53 }
 0xc05   :  { %v2725_v14 = vsub.f32 %v2719_v13, %v2724_v63 }
 0xc07   :  { %v2726_v0 = vmul.f32 %v2725_v14, %v2725_v14 }
 0xc09   :  { %v2727_v1 = vsel %vm2720_vm9, %v2726_v0, 0.0 }
 0xc0a   :  { %2728 = vadd.xlane.f32.xlu1 %v2727_v1 }
 0xc97   :  { %v2729_v5 = vpop.xlane.xlu1 %2728 }
 0xc98   :  { %v2730_v32 = vmul.f32 0.03125, %v2729_v5 }
 0xc9a   :  { %v2731_v6 = vadd.f32 1e-05, %v2730_v32 }
 0xc9c   :  { %3800 = vrsqrt.f32 %v2731_v6 }
 0xca6   :  { %v3801_v7 = vpop.eup %3800 }
 0xca7   :  { %v2733_v8 = vmul.f32 %v3801_v7, %v2725_v14 }
 0xca9   :  { %v2741_v58 = vmul.f32 %v2901_v15, %v2733_v8 }
 0xcab   :  { %v2749_v16 = vadd.f32 %v2902_v10, %v2741_v58 }
 0xcad   :  { %3407 = vmatmul.mubr.msk.f32.vlgmr.msra.gmra.mrb[42].mxu1 %vm307_vm3, %v2749_v16 }
 0xd80   :  { %v2830_v57 = vpop.f32.mrb[42].mxu1 }
 0xd81   :  { %v2831_v20 = vadd.f32 %v2903_v17, %v2830_v57  ;;  %v3408_v21 = vpop.f32.mrb[43].mxu1 }
 0xd83   :  { %2835 = vst.msk [vmem:[#allocation2] sm:$0x3] %vm2834_vm10, %v2831_v20 }
 0xd84   :  { %3813 = shalt.err (!%p3810_p4)
}
 0xd85   :  { %s3814_s7 = scalar_lea.hbm %s5385_s28, 32 }
 0xd86   :  { %p3815_p5 = scmp.ne.s32.totalorder %s5385_s28, %s3814_s7  ;;  %p3818_p6 = scmp.lt.u32.totalorder %s3814_s7, %s5385_s28 }
 0xd88   :  { %p3820_p7 = pnand %p3818_p6, %p3815_p5 }
 0xd8a   :  { %3823 = shalt.err (!%p3820_p7)
}
 0xd8b   :  { %2845 = dma.vmem_to_hbm [thread:$0]  %s2843_s29, 32, %s5385_s28, [#allocation3]  }
 0xd8c   :  { %3824 = dma.done.wait [#allocation3], 32  }
 0xd8d   :  { %3825 = vsyncadd [#allocation3], 4294967264 }
 0xd8e   :  { %2849 = vsyncpa [#allocation3], 1 }

</bundles_post_ra>
